<compile_context>
chip_gen: v5e
topology: v5e:2x2
jax: 0.10.0
libtpu: 0.0.40
codegen_flags: <defaults>
</compile_context>

<pallas_src>
import functools

import jax
import jax.numpy as jnp
from jax import lax
from jax.experimental import pallas as pl
from jax.experimental.pallas import tpu as pltpu

# SELU constants (match torch.nn.SELU)
_SELU_ALPHA = 1.6732632423543772
_SELU_SCALE = 1.0507009873554805

_LANE = 128
_SUBLANE = 8
_UNROLL_RES_MAX = 4  # unroll residual blocks up to this depth; fori_loop beyond


def _selu(x):
    # Clamp before exp: the positive branch is discarded by the select anyway,
    # and clamping avoids spurious inf / FP-flag pollution on large positives.
    neg = _SELU_ALPHA * (jnp.exp(jnp.minimum(x, 0.0)) - 1.0)
    return _SELU_SCALE * jnp.where(x > 0, x, neg)


def _round_up(n, m):
    return ((n + m - 1) // m) * m


def _pad2d(a, rows, cols):
    pr, pc = rows - a.shape[0], cols - a.shape[1]
    if pr or pc:
        a = jnp.pad(a, ((0, pr), (0, pc)))
    return a


def _resnet_kernel(n_resblocks,
                   x_ref, w0_ref, b0_ref, wres_ref, bres_ref,
                   wout_ref, bout_ref, o_ref):
    """Whole forward pass on one batch tile.

    x arrives as f32; the bf16 cast for the MXU happens here (VPU cast hides
    under MXU slack).  Weights are bf16 MXU operands, biases f32, activations
    carried in f32.
    """
    x = x_ref[...].astype(jnp.bfloat16)

    # Input linear + SELU (f32 accumulation).
    h = jnp.dot(x, w0_ref[...], preferred_element_type=jnp.float32) + b0_ref[...]
    h = _selu(h)

    # Residual blocks: SELU(L(SELU(L(h))) + h) with the same L applied twice.
    def res_step(i, h):
        w = wres_ref[i]          # (H, H) bf16
        b = bres_ref[i]          # (1, H) f32
        t = jnp.dot(h.astype(jnp.bfloat16), w,
                    preferred_element_type=jnp.float32) + b
        t = _selu(t)
        t = jnp.dot(t.astype(jnp.bfloat16), w,
                    preferred_element_type=jnp.float32) + b
        return _selu(t + h)

    if n_resblocks > 0:
        if n_resblocks <= _UNROLL_RES_MAX:
            # Shallow stacks: static unroll (full LLO scheduler visibility).
            for i in range(n_resblocks):
                h = res_step(i, h)
        else:
            # Deep stacks: bounded live ranges / code size.
            h = lax.fori_loop(0, n_resblocks, res_step, h)

    # Output linear.
    out = (jnp.dot(h.astype(jnp.bfloat16), wout_ref[...],
                   preferred_element_type=jnp.float32) + bout_ref[...])
    o_ref[...] = out.astype(o_ref.dtype)


def _const_spec(shape):
    """Grid-invariant operand: full array, constant index map, single-buffered."""
    ndim = len(shape)
    return pl.BlockSpec(shape, lambda i: (0,) * ndim,
                        pipeline_mode=pl.Buffered(1))


def _pick_batch_tile(batch, max_tile=256):
    """Rows per MXU pass: as fat as reasonable, but keep >= 2 grid steps when
    the batch allows it so dimension_semantics=('parallel',) can use both
    TensorCores on v7x."""
    b8 = _round_up(batch, _SUBLANE)
    if b8 <= max_tile:
        if b8 >= 2 * _SUBLANE:
            return _round_up((b8 + 1) // 2, _SUBLANE)
        return b8
    return max_tile


def prepare_params(params, out_dim):
    """Pad feature dims to multiples of 128 and cast matmul operands to bf16.

    Call once per parameter set (outside the hot path).  Zero padding is exact
    (padded weight rows/cols and biases are zero, SELU(0) == 0), so padded
    lanes stay identically zero through the whole network.
    """
    in_dim, h0 = params["w0"].shape
    n_res = len(params["res"])

    in_pad = _round_up(in_dim, _LANE)
    h_pad = _round_up(h0, _LANE)
    out_pad = _round_up(out_dim, _LANE)

    w0 = _pad2d(params["w0"], in_pad, h_pad).astype(jnp.bfloat16)
    b0 = _pad2d(params["b0"], 1, h_pad).astype(jnp.float32)
    if n_res > 0:
        wres = jnp.stack([_pad2d(w, h_pad, h_pad) for w, _ in params["res"]]
                         ).astype(jnp.bfloat16)
        bres = jnp.stack([_pad2d(b, 1, h_pad) for _, b in params["res"]]
                         ).astype(jnp.float32)
    else:
        # Dummy (never read when n_res == 0); avoids zero-sized blocks.
        wres = jnp.zeros((1, h_pad, h_pad), jnp.bfloat16)
        bres = jnp.zeros((1, 1, h_pad), jnp.float32)
    w_out = _pad2d(params["w_out"], h_pad, out_pad).astype(jnp.bfloat16)
    b_out = _pad2d(params["b_out"], 1, out_pad).astype(jnp.float32)

    return {"w0": w0, "b0": b0, "wres": wres, "bres": bres,
            "w_out": w_out, "b_out": b_out,
            "geom": {"in_dim": in_dim, "in_pad": in_pad, "h_pad": h_pad,
                     "out_dim": out_dim, "out_pad": out_pad, "n_res": n_res}}


def resnet_forward(x, prepared, *, batch_tile=None):
    """Forward pass.  `prepared` comes from prepare_params()."""
    g = prepared["geom"]
    in_dim, in_pad = g["in_dim"], g["in_pad"]
    h_pad, out_dim, out_pad = g["h_pad"], g["out_dim"], g["out_pad"]
    n_res = g["n_res"]

    B = x.shape[0]
    bt = batch_tile if batch_tile is not None else _pick_batch_tile(B)
    B_pad = _round_up(B, bt)

    # Only shape padding here; the bf16 cast is fused into the kernel.
    x_p = x
    if B_pad != B or in_pad != in_dim:
        x_p = jnp.pad(x, ((0, B_pad - B), (0, in_pad - in_dim)))

    flat = (prepared["w0"], prepared["b0"], prepared["wres"], prepared["bres"],
            prepared["w_out"], prepared["b_out"])

    in_specs = [pl.BlockSpec((bt, in_pad), lambda i: (i, 0))]
    in_specs += [_const_spec(p.shape) for p in flat]

    kernel = functools.partial(_resnet_kernel, n_res)

    # Advisory cost estimate (flops / exp count / HBM bytes).
    flops = 2 * B_pad * (in_pad * h_pad + n_res * 2 * h_pad * h_pad
                         + h_pad * out_pad)
    transcendentals = B_pad * h_pad * (1 + 2 * n_res)
    bytes_accessed = (x_p.size * x_p.dtype.itemsize
                      + sum(p.size * p.dtype.itemsize for p in flat)
                      + B_pad * out_pad * 4)

    # VMEM budget: single-buffered resident weights + double-buffered x/out
    # tiles + activation headroom.
    # TODO(synk): when resident weights exceed ~24-32 MiB (wide hidden / deep
    # stacks on v7x's 64 MiB VMEM), switch the res-block weights to a streamed
    # second "arbitrary" grid axis (or pltpu.emit_pipeline) instead of keeping
    # them all resident.
    weight_bytes = sum(p.size * p.dtype.itemsize for p in flat)
    tile_bytes = 2 * bt * in_pad * 4 + 2 * bt * out_pad * 4
    act_bytes = 6 * bt * h_pad * 4
    vmem_limit = int(min(128 * 2 ** 20,
                         max(32 * 2 ** 20,
                             2 * (weight_bytes + tile_bytes + act_bytes))))

    out_padded = pl.pallas_call(
        kernel,
        out_shape=jax.ShapeDtypeStruct((B_pad, out_pad), jnp.float32),
        grid_spec=pltpu.PrefetchScalarGridSpec(
            num_scalar_prefetch=0,
            grid=(B_pad // bt,),
            in_specs=in_specs,
            out_specs=pl.BlockSpec((bt, out_pad), lambda i: (i, 0)),
        ),
        compiler_params=pltpu.CompilerParams(
            dimension_semantics=("parallel",),
            vmem_limit_bytes=vmem_limit),
        cost_estimate=pl.CostEstimate(
            flops=int(flops), transcendentals=int(transcendentals),
            bytes_accessed=int(bytes_accessed)),
    )(x_p, *flat)

    return out_padded[:B, :out_dim]


def init_params(key, input_size, hidden_sizes, out_dim):
    """Deterministic init mirroring nn.Linear default (uniform +-1/sqrt(fan_in))."""
    def linear_init(k, fan_in, fan_out):
        kw, kb = jax.random.split(k)
        bound = 1.0 / jnp.sqrt(float(fan_in))
        w = jax.random.uniform(kw, (fan_in, fan_out), jnp.float32, -bound, bound)
        b = jax.random.uniform(kb, (1, fan_out), jnp.float32, -bound, bound)
        return w, b

    keys = jax.random.split(key, 2 + len(hidden_sizes))
    w0, b0 = linear_init(keys[0], input_size, hidden_sizes[0])
    res = []
    prev = hidden_sizes[0]
    for i, w in enumerate(hidden_sizes[1:]):
        # ResBlock(w) requires prev == w to be shape-consistent (as in reference).
        assert prev == w, "ResBlock width must match incoming width"
        res.append(linear_init(keys[1 + i], w, w))
        prev = w
    w_out, b_out = linear_init(keys[-1], prev, out_dim)
    return {"w0": w0, "b0": b0, "res": res, "w_out": w_out, "b_out": b_out}


def resnet_reference_bf16(x, params):
    """Pure-JAX reference using the same bf16-operand / f32-accumulate path."""
    def dot(a, w):
        return jnp.dot(a.astype(jnp.bfloat16), w.astype(jnp.bfloat16),
                       preferred_element_type=jnp.float32)

    h = _selu(dot(x, params["w0"]) + params["b0"])
    for w, b in params["res"]:
        t = _selu(dot(h, w) + b)
        t = dot(t, w) + b
        h = _selu(t + h)
    return dot(h, params["w_out"]) + params["b_out"]


def resnet_reference_f32(x, params):
    """Full-f32 reference (matches the PyTorch module up to fp error)."""
    h = _selu(jnp.dot(x, params["w0"]) + params["b0"])
    for w, b in params["res"]:
        t = _selu(jnp.dot(h, w) + b)
        t = jnp.dot(t, w) + b
        h = _selu(t + h)
    return jnp.dot(h, params["w_out"]) + params["b_out"]


if __name__ == "__main__":
    # Small-but-MXU-friendly shapes consistent with the module's forward.
    batch = 256
    input_size = 16
    hidden_sizes = [128, 128, 128]   # -> input Linear + 2 ResBlocks of width 128
    out_dim = 8

    key = jax.random.PRNGKey(0)
    kx, kp = jax.random.split(key)
    x = jax.random.normal(kx, (batch, input_size), jnp.float32)
    params = init_params(kp, input_size, hidden_sizes, out_dim)

    # Pad/cast weights exactly once (not per forward call).
    prepared = prepare_params(params, out_dim)

    out = resnet_forward(x, prepared)          # auto batch_tile (128 -> grid=2)
    out = jax.block_until_ready(out)

    ref_bf16 = resnet_reference_bf16(x, params)
    ref_f32 = resnet_reference_f32(x, params)
    assert out.shape == (batch, out_dim)
    assert jnp.allclose(out, ref_bf16, atol=1e-2, rtol=1e-2), \
        "mismatch vs bf16-path reference"
    assert jnp.allclose(out, ref_f32, atol=2e-1, rtol=1e-1), \
        "mismatch vs f32 reference"

    print("KERNEL_OK")
</pallas_src>

<mosaic_0001>
module attributes {stable_mosaic.version = 11 : i64} {
  func.func @_resnet_kernel(%arg0: i32, %arg1: memref<128x128xf32, #tpu.memory_space<vmem>>, %arg2: memref<128x128xbf16, #tpu.memory_space<vmem>>, %arg3: memref<1x128xf32, #tpu.memory_space<vmem>>, %arg4: memref<2x128x128xbf16, #tpu.memory_space<vmem>>, %arg5: memref<2x1x128xf32, #tpu.memory_space<vmem>>, %arg6: memref<128x128xbf16, #tpu.memory_space<vmem>>, %arg7: memref<1x128xf32, #tpu.memory_space<vmem>>, %arg8: memref<128x128xf32, #tpu.memory_space<vmem>>) attributes {dimension_semantics = [#tpu.dimension_semantics<parallel>], iteration_bounds = array<i64: 2>, scalar_prefetch = 0 : i64, scratch_operands = 0 : i64, tpu.core_type = #tpu.core_type<tc>, window_params = [{transform_indices = @transform_0, window_bounds = array<i64: 128, 128>}, {pipeline_mode = #tpu.pipeline_mode<synchronous>, transform_indices = @transform_1, window_bounds = array<i64: 128, 128>}, {pipeline_mode = #tpu.pipeline_mode<synchronous>, transform_indices = @transform_2, window_bounds = array<i64: 1, 128>}, {pipeline_mode = #tpu.pipeline_mode<synchronous>, transform_indices = @transform_3, window_bounds = array<i64: 2, 128, 128>}, {pipeline_mode = #tpu.pipeline_mode<synchronous>, transform_indices = @transform_4, window_bounds = array<i64: 2, 1, 128>}, {pipeline_mode = #tpu.pipeline_mode<synchronous>, transform_indices = @transform_5, window_bounds = array<i64: 128, 128>}, {pipeline_mode = #tpu.pipeline_mode<synchronous>, transform_indices = @transform_6, window_bounds = array<i64: 1, 128>}, {transform_indices = @transform_7, window_bounds = array<i64: 128, 128>}]} {
    %c0 = arith.constant 0 : index
    %c0_0 = arith.constant 0 : index
    %0 = vector.load %arg1[%c0, %c0_0] : memref<128x128xf32, #tpu.memory_space<vmem>>, vector<128x128xf32>
    %1 = arith.truncf %0 : vector<128x128xf32> to vector<128x128xbf16>
    %c0_1 = arith.constant 0 : index
    %c0_2 = arith.constant 0 : index
    %2 = vector.load %arg2[%c0_1, %c0_2] : memref<128x128xbf16, #tpu.memory_space<vmem>>, vector<128x128xbf16>
    %cst = arith.constant dense<0.000000e+00> : vector<128x128xf32>
    %3 = tpu.matmul %1, %2, %cst {dimension_numbers = #tpu.dot_dimension_numbers<[1], [0], [0], [1], [0, 0, 1, 1], [], []>} : vector<128x128xbf16>, vector<128x128xbf16>, vector<128x128xf32> -> vector<128x128xf32>
    %c0_3 = arith.constant 0 : index
    %c0_4 = arith.constant 0 : index
    %4 = vector.load %arg3[%c0_3, %c0_4] : memref<1x128xf32, #tpu.memory_space<vmem>>, vector<1x128xf32>
    %5 = vector.broadcast %4 : vector<1x128xf32> to vector<128x128xf32>
    %6 = arith.addf %3, %5 : vector<128x128xf32>
    %cst_5 = arith.constant 0.000000e+00 : f32
    %7 = vector.broadcast %cst_5 : f32 to vector<128x128xf32>
    %8 = arith.minimumf %6, %7 : vector<128x128xf32>
    %9 = math.exp %8 : vector<128x128xf32>
    %cst_6 = arith.constant 1.000000e+00 : f32
    %10 = vector.broadcast %cst_6 : f32 to vector<128x128xf32>
    %11 = arith.subf %9, %10 : vector<128x128xf32>
    %cst_7 = arith.constant 1.67326319 : f32
    %12 = vector.broadcast %cst_7 : f32 to vector<128x128xf32>
    %13 = arith.mulf %12, %11 : vector<128x128xf32>
    %cst_8 = arith.constant 0.000000e+00 : f32
    %14 = vector.broadcast %cst_8 : f32 to vector<128x128xf32>
    %15 = arith.cmpf ogt, %6, %14 : vector<128x128xf32>
    %16 = arith.select %15, %6, %13 : vector<128x128xi1>, vector<128x128xf32>
    %cst_9 = arith.constant 1.05070102 : f32
    %17 = vector.broadcast %cst_9 : f32 to vector<128x128xf32>
    %18 = arith.mulf %17, %16 : vector<128x128xf32>
    %c0_10 = arith.constant 0 : index
    %c0_11 = arith.constant 0 : index
    %c0_12 = arith.constant 0 : index
    %19 = vector.load %arg4[%c0_10, %c0_11, %c0_12] : memref<2x128x128xbf16, #tpu.memory_space<vmem>>, vector<1x128x128xbf16>
    %20 = vector.shape_cast %19 : vector<1x128x128xbf16> to vector<128x128xbf16>
    %c0_13 = arith.constant 0 : index
    %c0_14 = arith.constant 0 : index
    %c0_15 = arith.constant 0 : index
    %21 = vector.load %arg5[%c0_13, %c0_14, %c0_15] : memref<2x1x128xf32, #tpu.memory_space<vmem>>, vector<1x1x128xf32>
    %22 = vector.shape_cast %21 : vector<1x1x128xf32> to vector<1x128xf32>
    %23 = arith.truncf %18 : vector<128x128xf32> to vector<128x128xbf16>
    %cst_16 = arith.constant dense<0.000000e+00> : vector<128x128xf32>
    %24 = tpu.matmul %23, %20, %cst_16 {dimension_numbers = #tpu.dot_dimension_numbers<[1], [0], [0], [1], [0, 0, 1, 1], [], []>} : vector<128x128xbf16>, vector<128x128xbf16>, vector<128x128xf32> -> vector<128x128xf32>
    %25 = vector.broadcast %22 : vector<1x128xf32> to vector<128x128xf32>
    %26 = arith.addf %24, %25 : vector<128x128xf32>
    %cst_17 = arith.constant 0.000000e+00 : f32
    %27 = vector.broadcast %cst_17 : f32 to vector<128x128xf32>
    %28 = arith.minimumf %26, %27 : vector<128x128xf32>
    %29 = math.exp %28 : vector<128x128xf32>
    %cst_18 = arith.constant 1.000000e+00 : f32
    %30 = vector.broadcast %cst_18 : f32 to vector<128x128xf32>
    %31 = arith.subf %29, %30 : vector<128x128xf32>
    %cst_19 = arith.constant 1.67326319 : f32
    %32 = vector.broadcast %cst_19 : f32 to vector<128x128xf32>
    %33 = arith.mulf %32, %31 : vector<128x128xf32>
    %cst_20 = arith.constant 0.000000e+00 : f32
    %34 = vector.broadcast %cst_20 : f32 to vector<128x128xf32>
    %35 = arith.cmpf ogt, %26, %34 : vector<128x128xf32>
    %36 = arith.select %35, %26, %33 : vector<128x128xi1>, vector<128x128xf32>
    %cst_21 = arith.constant 1.05070102 : f32
    %37 = vector.broadcast %cst_21 : f32 to vector<128x128xf32>
    %38 = arith.mulf %37, %36 : vector<128x128xf32>
    %39 = arith.truncf %38 : vector<128x128xf32> to vector<128x128xbf16>
    %cst_22 = arith.constant dense<0.000000e+00> : vector<128x128xf32>
    %40 = tpu.matmul %39, %20, %cst_22 {dimension_numbers = #tpu.dot_dimension_numbers<[1], [0], [0], [1], [0, 0, 1, 1], [], []>} : vector<128x128xbf16>, vector<128x128xbf16>, vector<128x128xf32> -> vector<128x128xf32>
    %41 = vector.broadcast %22 : vector<1x128xf32> to vector<128x128xf32>
    %42 = arith.addf %40, %41 : vector<128x128xf32>
    %43 = arith.addf %42, %18 : vector<128x128xf32>
    %cst_23 = arith.constant 0.000000e+00 : f32
    %44 = vector.broadcast %cst_23 : f32 to vector<128x128xf32>
    %45 = arith.minimumf %43, %44 : vector<128x128xf32>
    %46 = math.exp %45 : vector<128x128xf32>
    %cst_24 = arith.constant 1.000000e+00 : f32
    %47 = vector.broadcast %cst_24 : f32 to vector<128x128xf32>
    %48 = arith.subf %46, %47 : vector<128x128xf32>
    %cst_25 = arith.constant 1.67326319 : f32
    %49 = vector.broadcast %cst_25 : f32 to vector<128x128xf32>
    %50 = arith.mulf %49, %48 : vector<128x128xf32>
    %cst_26 = arith.constant 0.000000e+00 : f32
    %51 = vector.broadcast %cst_26 : f32 to vector<128x128xf32>
    %52 = arith.cmpf ogt, %43, %51 : vector<128x128xf32>
    %53 = arith.select %52, %43, %50 : vector<128x128xi1>, vector<128x128xf32>
    %cst_27 = arith.constant 1.05070102 : f32
    %54 = vector.broadcast %cst_27 : f32 to vector<128x128xf32>
    %55 = arith.mulf %54, %53 : vector<128x128xf32>
    %c1 = arith.constant 1 : index
    %c0_28 = arith.constant 0 : index
    %c0_29 = arith.constant 0 : index
    %56 = vector.load %arg4[%c1, %c0_28, %c0_29] : memref<2x128x128xbf16, #tpu.memory_space<vmem>>, vector<1x128x128xbf16>
    %57 = vector.shape_cast %56 : vector<1x128x128xbf16> to vector<128x128xbf16>
    %c1_30 = arith.constant 1 : index
    %c0_31 = arith.constant 0 : index
    %c0_32 = arith.constant 0 : index
    %58 = vector.load %arg5[%c1_30, %c0_31, %c0_32] : memref<2x1x128xf32, #tpu.memory_space<vmem>>, vector<1x1x128xf32>
    %59 = vector.shape_cast %58 : vector<1x1x128xf32> to vector<1x128xf32>
    %60 = arith.truncf %55 : vector<128x128xf32> to vector<128x128xbf16>
    %cst_33 = arith.constant dense<0.000000e+00> : vector<128x128xf32>
    %61 = tpu.matmul %60, %57, %cst_33 {dimension_numbers = #tpu.dot_dimension_numbers<[1], [0], [0], [1], [0, 0, 1, 1], [], []>} : vector<128x128xbf16>, vector<128x128xbf16>, vector<128x128xf32> -> vector<128x128xf32>
    %62 = vector.broadcast %59 : vector<1x128xf32> to vector<128x128xf32>
    %63 = arith.addf %61, %62 : vector<128x128xf32>
    %cst_34 = arith.constant 0.000000e+00 : f32
    %64 = vector.broadcast %cst_34 : f32 to vector<128x128xf32>
    %65 = arith.minimumf %63, %64 : vector<128x128xf32>
    %66 = math.exp %65 : vector<128x128xf32>
    %cst_35 = arith.constant 1.000000e+00 : f32
    %67 = vector.broadcast %cst_35 : f32 to vector<128x128xf32>
    %68 = arith.subf %66, %67 : vector<128x128xf32>
    %cst_36 = arith.constant 1.67326319 : f32
    %69 = vector.broadcast %cst_36 : f32 to vector<128x128xf32>
    %70 = arith.mulf %69, %68 : vector<128x128xf32>
    %cst_37 = arith.constant 0.000000e+00 : f32
    %71 = vector.broadcast %cst_37 : f32 to vector<128x128xf32>
    %72 = arith.cmpf ogt, %63, %71 : vector<128x128xf32>
    %73 = arith.select %72, %63, %70 : vector<128x128xi1>, vector<128x128xf32>
    %cst_38 = arith.constant 1.05070102 : f32
    %74 = vector.broadcast %cst_38 : f32 to vector<128x128xf32>
    %75 = arith.mulf %74, %73 : vector<128x128xf32>
    %76 = arith.truncf %75 : vector<128x128xf32> to vector<128x128xbf16>
    %cst_39 = arith.constant dense<0.000000e+00> : vector<128x128xf32>
    %77 = tpu.matmul %76, %57, %cst_39 {dimension_numbers = #tpu.dot_dimension_numbers<[1], [0], [0], [1], [0, 0, 1, 1], [], []>} : vector<128x128xbf16>, vector<128x128xbf16>, vector<128x128xf32> -> vector<128x128xf32>
    %78 = vector.broadcast %59 : vector<1x128xf32> to vector<128x128xf32>
    %79 = arith.addf %77, %78 : vector<128x128xf32>
    %80 = arith.addf %79, %55 : vector<128x128xf32>
    %cst_40 = arith.constant 0.000000e+00 : f32
    %81 = vector.broadcast %cst_40 : f32 to vector<128x128xf32>
    %82 = arith.minimumf %80, %81 : vector<128x128xf32>
    %83 = math.exp %82 : vector<128x128xf32>
    %cst_41 = arith.constant 1.000000e+00 : f32
    %84 = vector.broadcast %cst_41 : f32 to vector<128x128xf32>
    %85 = arith.subf %83, %84 : vector<128x128xf32>
    %cst_42 = arith.constant 1.67326319 : f32
    %86 = vector.broadcast %cst_42 : f32 to vector<128x128xf32>
    %87 = arith.mulf %86, %85 : vector<128x128xf32>
    %cst_43 = arith.constant 0.000000e+00 : f32
    %88 = vector.broadcast %cst_43 : f32 to vector<128x128xf32>
    %89 = arith.cmpf ogt, %80, %88 : vector<128x128xf32>
    %90 = arith.select %89, %80, %87 : vector<128x128xi1>, vector<128x128xf32>
    %cst_44 = arith.constant 1.05070102 : f32
    %91 = vector.broadcast %cst_44 : f32 to vector<128x128xf32>
    %92 = arith.mulf %91, %90 : vector<128x128xf32>
    %93 = arith.truncf %92 : vector<128x128xf32> to vector<128x128xbf16>
    %c0_45 = arith.constant 0 : index
    %c0_46 = arith.constant 0 : index
    %94 = vector.load %arg6[%c0_45, %c0_46] : memref<128x128xbf16, #tpu.memory_space<vmem>>, vector<128x128xbf16>
    %cst_47 = arith.constant dense<0.000000e+00> : vector<128x128xf32>
    %95 = tpu.matmul %93, %94, %cst_47 {dimension_numbers = #tpu.dot_dimension_numbers<[1], [0], [0], [1], [0, 0, 1, 1], [], []>} : vector<128x128xbf16>, vector<128x128xbf16>, vector<128x128xf32> -> vector<128x128xf32>
    %c0_48 = arith.constant 0 : index
    %c0_49 = arith.constant 0 : index
    %96 = vector.load %arg7[%c0_48, %c0_49] : memref<1x128xf32, #tpu.memory_space<vmem>>, vector<1x128xf32>
    %97 = vector.broadcast %96 : vector<1x128xf32> to vector<128x128xf32>
    %98 = arith.addf %95, %97 : vector<128x128xf32>
    %c0_50 = arith.constant 0 : index
    %c0_51 = arith.constant 0 : index
    %99 = vector.load %arg8[%c0_50, %c0_51] : memref<128x128xf32, #tpu.memory_space<vmem>>, vector<128x128xf32>
    tpu.vector_store %arg8[%c0_50, %c0_51], %98 {strides = array<i32>} : memref<128x128xf32, #tpu.memory_space<vmem>>, vector<128x128xf32>,
    return
  }
  func.func @transform_0(%arg0: i32) -> (i32, i32) {
    %c0_i32 = arith.constant 0 : i32
    %c0_i32_0 = arith.constant 0 : i32
    return %arg0, %c0_i32 : i32, i32
  }
  func.func @transform_1(%arg0: i32) -> (i32, i32) {
    %c0_i32 = arith.constant 0 : i32
    %c0_i32_0 = arith.constant 0 : i32
    %c0_i32_1 = arith.constant 0 : i32
    return %c0_i32, %c0_i32_0 : i32, i32
  }
  func.func @transform_2(%arg0: i32) -> (i32, i32) {
    %c0_i32 = arith.constant 0 : i32
    %c0_i32_0 = arith.constant 0 : i32
    %c0_i32_1 = arith.constant 0 : i32
    return %c0_i32, %c0_i32_0 : i32, i32
  }
  func.func @transform_3(%arg0: i32) -> (i32, i32, i32) {
    %c0_i32 = arith.constant 0 : i32
    %c0_i32_0 = arith.constant 0 : i32
    %c0_i32_1 = arith.constant 0 : i32
    %c0_i32_2 = arith.constant 0 : i32
    return %c0_i32, %c0_i32_0, %c0_i32_1 : i32, i32, i32
  }
  func.func @transform_4(%arg0: i32) -> (i32, i32, i32) {
    %c0_i32 = arith.constant 0 : i32
    %c0_i32_0 = arith.constant 0 : i32
    %c0_i32_1 = arith.constant 0 : i32
    %c0_i32_2 = arith.constant 0 : i32
    return %c0_i32, %c0_i32_0, %c0_i32_1 : i32, i32, i32
  }
  func.func @transform_5(%arg0: i32) -> (i32, i32) {
    %c0_i32 = arith.constant 0 : i32
    %c0_i32_0 = arith.constant 0 : i32
    %c0_i32_1 = arith.constant 0 : i32
    return %c0_i32, %c0_i32_0 : i32, i32
  }
  func.func @transform_6(%arg0: i32) -> (i32, i32) {
    %c0_i32 = arith.constant 0 : i32
    %c0_i32_0 = arith.constant 0 : i32
    %c0_i32_1 = arith.constant 0 : i32
    return %c0_i32, %c0_i32_0 : i32, i32
  }
  func.func @transform_7(%arg0: i32) -> (i32, i32) {
    %c0_i32 = arith.constant 0 : i32
    %c0_i32_0 = arith.constant 0 : i32
    return %arg0, %c0_i32 : i32, i32
  }
}

</mosaic_0001>

<bundles_post_ra>
// kernel: tpu_custom_call.1
= control target key start
LH: loop header
LB: loop body
LE: loop exit
PB: predicated region body
PF: predicated region fallthrough
CT: control target
= control target key end

     0   :  { %s3007_s0 = inlined_call_operand.hbm [shape: f32[256,128], index: 0, kind: input, shape index: {}]   ;;  %s3008_s1 = inlined_call_operand.hbm [shape: bf16[128,128], index: 1, kind: input, shape index: {}]   ;;  %s3009_s2 = inlined_call_operand.vmem [shape: f32[1,128], index: 2, kind: input, shape index: {}]   ;;  %s3010_s3 = inlined_call_operand.hbm [shape: bf16[2,128,128], index: 3, kind: input, shape index: {}]   ;;  %s3011_s4 = inlined_call_operand.vmem [shape: f32[2,1,128], index: 4, kind: input, shape index: {}]   ;;  %s3012_s5 = inlined_call_operand.hbm [shape: bf16[128,128], index: 5, kind: input, shape index: {}]   ;;  %s3013_s6 = inlined_call_operand.vmem [shape: f32[1,128], index: 6, kind: input, shape index: {}]   ;;  %s3014_s7 = inlined_call_operand.hbm [shape: f32[256,128], index: 7, kind: output, shape index: {}]  }
   0x1   :  { %3015 = sst [smem:[#allocation15_spill]] %s3008_s1 }
   0x2   :  { %12 = vsyncpa [#allocation3], 0 }
   0x3   :  { %14 = vsyncpa [#allocation3 + $0x1], 0 }
   0x4   :  { %15 = vsyncpa [#allocation6], 0 }
   0x5   :  { %16 = vsyncpa [#allocation9], 0 }
   0x6   :  { %17 = vsyncpa [#allocation4], 0 }
   0x7   :  { %19 = vsyncpa [#allocation4 + $0x1], 0  ;;  %s2560_s24 = smov 0   ;;  %s2562_s25 = smov 0  }
   0x8   :  { %s2564_s26 = smov 0   ;;  %s2566_s27 = smov 0  }
   0x9 LB: > { %s2581_s28 = sadd.s32 4294967295, %s2509_s27   ;;  %s1789_s29 = sadd.s32 4294967294, %s2509_s27   ;;  %s2509_s27 = sphi %s2566_s27, %s3027_s27   ;;  %s2505_s26 = sphi %s2564_s26, %s3026_s26   ;;  %s2501_s25 = sphi %s2562_s25, %s3025_s25   ;;  %s2497_s24 = sphi %s2560_s24, %s3024_s24  }
   0xa   : > { %p45_p0 = scmp.ne.s32.totalorder %s2501_s25, %s2497_s24  ;;  %p46_p1 = scmp.eq.s32.totalorder %s2581_s28, 0 }
   0xb   : > { %p195_p2 = scmp.eq.s32.totalorder %s2581_s28, 1  ;;  %p201_p3 = scmp.eq.s32.totalorder %s1789_s29, 1 }
   0xc   : > { %p2590_p4 = por %p46_p1, %p45_p0  ;;  %p1790_p5 = scmp.ge.s32.totalorder %s2509_s27, 1 }
   0xd   : > { %p2595_p6 = por %p201_p3, %p45_p0  ;;  %p208_p7 = scmp.lt.s32.totalorder %s2509_s27, 3 }
   0xe   : > { %s3018_s1 = sld [smem:[#allocation15_spill]]  ;;  %s2511_s13 = smov [#allocation5]  }
   0xf   : > { %p2603_p8 = pnand %p1790_p5, %p208_p7  ;;  %s221_s14 = sshll.u32 %s2511_s13, 4  ;;  %s222_s14 = int_to_ptr.vmem [resolvable:$true] %s221_s14 }
  0x10   : > { %s236_s18 = sshll.u32 %s3010_s3, 4  ;;  %s2512_s19 = smov 64   ;;  %s237_s18 = int_to_ptr.hbm [resolvable:$true] %s236_s18 }
  0x11   : > { %p2084_p9 = pneg %p2603_p8  ;;  %s2513_s20 = smov 4  }
  0x12   : > { %s2514_s21 = smov [#allocation7]   ;;  %s253_s9 = sshll.u32 %s3012_s5, 4  ;;  %s254_s9 = int_to_ptr.hbm [resolvable:$true] %s253_s9 }
  0x13   : > { %p2611_p10 = pnand %p2084_p9, %p46_p1  ;;  %s238_s22 = sshll.u32 %s2514_s21, 4  ;;  %s239_s22 = int_to_ptr.vmem [resolvable:$true] %s238_s22 }
  0x14   : > { %s219_s11 = sshll.u32 %s3018_s1, 4  ;;  %s2515_s10 = smov [#allocation8]   ;;  %s220_s11 = int_to_ptr.hbm [resolvable:$true] %s219_s11 }
  0x15   : > { %2087 = dma.hbm_to_vmem [thread:$0]  (!%p2611_p10), %s220_s11, 1024, %s222_s14, [#allocation6], %s2512_s19, %s2512_s19, %s2513_s20  }
  0x16   : > { %2090 = dma.hbm_to_vmem [thread:$0]  (!%p2611_p10), %s237_s18, 2048, %s239_s22, [#allocation6], %s2512_s19, %s2512_s19, %s2513_s20  }
  0x17   : > { %s255_s13 = sshll.u32 %s2515_s10, 4  ;;  %s2627_s11 = sadd.s32 1, %s2509_s27   ;;  %s256_s13 = int_to_ptr.vmem [resolvable:$true] %s255_s13 }
  0x18   : > { %2093 = dma.hbm_to_vmem [thread:$0]  (!%p2611_p10), %s254_s9, 1024, %s256_s13, [#allocation9], %s2512_s19, %s2512_s19, %s2513_s20  }
  0x19   : > { %s29_s14 = ssub.s32 %s2509_s27, %s2627_s11  ;;  %s32_s16 = sadd.s32 1, %s2505_s26 }
  0x1a   : > { %p30_p12 = scmp.eq.s32.totalorder %s29_s14, 0  ;;  %p39_p13 = scmp.ne.s32.totalorder %s2505_s26, %s2501_s25 }
  0x1b   : > { %p40_p0 = scmp.eq.s32.totalorder %s2509_s27, 0  ;;  %p2105_p3 = scmp.lt.s32.totalorder %s2509_s27, 2 }
  0x1c   : > { %s2639_s17 = scalar_select %p30_p12, %s2505_s26, %s32_s16  }
  0x1d   : > { %p41_p5 = por %p40_p0, %p39_p13  ;;  %p2643_p7 = por %p195_p2, %p39_p13 }
  0x1e   : > { %s272_s21 = sand.u32 1, %s2505_s26   ;;  %s2018_s22 = sshll.u32 %s2509_s27, 7 }
  0x1f   : > { %s1795_s15 = sshll.u32 %s272_s21, 7  ;;  %s281_s20 = scalar_lea.hbm %s3007_s0, %s2018_s22 }
  0x20   : > { %s282_s29 = sshll.u32 %s281_s20, 4  ;;  %s276_s9 = scalar_lea.vmem [#allocation2], %s1795_s15  ;;  %s283_s29 = int_to_ptr.hbm [resolvable:$true] %s282_s29 }
  0x21   : > { %s284_s10 = sshll.u32 %s276_s9, 4  ;;  %p2654_p9 = pnand %p2105_p3, %p41_p5  ;;  %s285_s10 = int_to_ptr.vmem [resolvable:$true] %s284_s10 }
  0x22   : > { %s273_s14 = scalar_lea.sflag [#allocation3], %s272_s21  ;;  %s2405_s16 = sshra.s32 %s283_s29, 4  ;;  %s2406_s16 = int_to_ptr.hbm [resolvable:$true] %s2405_s16 }
  0x23   : > { %s2407_s1 = scalar_lea.hbm %s2406_s16, 128  ;;  %p2409_p10 = pneg %p2654_p9 }
  0x24   : > { %p2408_p2 = scmp.ne.s32.totalorder %s2406_s16, %s2407_s1  ;;  %s2412_s23 = scalar_lea.hbm %s3007_s0, 256 }
  0x25   : > { %p2413_p0 = scmp.lt.s32.totalorder %s2406_s16, %s3007_s0  ;;  %p2414_p3 = scmp.lt.s32.totalorder %s2412_s23, %s2407_s1 }
  0x26   : > { %p2410_p12 = pnand %p2409_p10, %p2408_p2 }
  0x27   : > { %p2415_p5 = por %p2414_p3, %p2413_p0 }
  0x28   : > { %p2411_p13 = pneg %p2410_p12 }
  0x2a   : > { %p2416_p11 = pnand %p2415_p5, %p2411_p13 }
  0x2c   : > { %2419 = shalt.err (!%p2416_p11)
}
  0x2d   : > { %s2516_s21 = smov 128   ;;  %s2517_s9 = smov 8  }
  0x2e   : > { %2097 = dma.hbm_to_vmem [thread:$0]  (!%p2654_p9), %s283_s29, 2048, %s285_s10, %s273_s14, %s2516_s21, %s2516_s21, %s2517_s9  }
  0x2f   : > { %296 = sbr.rel (%p2603_p8) target bundleno = 1137 (0x471), region = 48  ;;  %s2671_s22 = sand.u32 (!%p2603_p8), 1, %s2501_s25  }
  0x30   : > { %s1799_s16 = sshll.u32 (!%p2603_p8), %s2671_s22, 7  ;;  %s299_s1 = scalar_lea.sflag (!%p2603_p8), [#allocation3], %s2671_s22 }
  0x31   : > { %s2677_s15 = scalar_lea.vmem (!%p2603_p8), [#allocation2], %s1799_s16 }
  0x34   : > { %2480 = dma.done.wait (%p2590_p4), %s299_s1, 2048  }
  0x35   : > { %2482 = vsyncadd (%p2590_p4), %s299_s1, 4294965248 }
  0x36   : > { %2484 = dma.done.wait (%p46_p1), [#allocation6], 3072  }
  0x37   : > { %2486 = vsyncadd (%p46_p1), [#allocation6], 4294964224 }
  0x38   : > { %2488 = dma.done.wait (%p46_p1), [#allocation9], 1024  }
  0x39   : > { %2490 = vsyncadd (%p46_p1), [#allocation9], 4294966272  ;;  %v2026_v0 = vld [vmem:[#allocation5 + $0x38] sm:$0xff]  ;;  %v2025_v1 = vld [vmem:[#allocation5 + $0x30] sm:$0xff]  ;;  %s2955_s20 = scalar_lea.vmem [#allocation10], %s1799_s16  ;;  %s2051_s21 = sshll.u32 %s2581_s28, 7 }
  0x3a   : > { %443 = vmatpush.bf16.msra.mxu0 %v2026_v0  ;;  %2052 = vmatpush.bf16.msra.mxu2 %v2026_v0  ;;  %v2024_v2 = vld [vmem:[#allocation5 + $0x28] sm:$0xff]  ;;  %v2023_v3 = vld [vmem:[#allocation5 + $0x20] sm:$0xff]  ;;  %v2022_v4 = vld [vmem:[#allocation5 + $0x18] sm:$0xff]  ;;  %s1683_s1 = scalar_lea.hbm %s3014_s7, %s2051_s21  ;;  %s1672_s12 = scalar_lea.sflag [#allocation4], %s2671_s22 }
  0x3b   : > { %v2021_v5 = vld [vmem:[#allocation5 + $0x10] sm:$0xff]  ;;  %v2020_v6 = vld [vmem:[#allocation5 + $0x8] sm:$0xff]  ;;  %v2019_v7 = vld [vmem:[#allocation5] sm:$0xff]  ;;  %s1686_s30 = sshll.u32 %s1683_s1, 4  ;;  %s2455_s14 = scalar_lea.hbm %s3014_s7, 256  ;;  %s1687_s30 = int_to_ptr.hbm [resolvable:$true] %s1686_s30 }
  0x3c   : > { %v351_v8 = vld [vmem:[%s2677_s15] sm:$0xff]  ;;  %v352_v9 = vld [vmem:[%s2677_s15 + $0x8] sm:$0xff]  ;;  %v353_v14 = vld [vmem:[%s2677_s15 + $0x10] sm:$0xff]  ;;  %s2449_s29 = sshra.s32 %s1687_s30, 4  ;;  %s2450_s29 = int_to_ptr.hbm [resolvable:$true] %s2449_s29 }
  0x3d   : > { %v359_v10 = vld [vmem:[%s2677_s15 + $0x40] sm:$0xff]  ;;  %v360_v11 = vld [vmem:[%s2677_s15 + $0x48] sm:$0xff]  ;;  %v367_v12 = vpack.c.bf16 %v352_v9, %v351_v8  ;;  %v354_v15 = vld [vmem:[%s2677_s15 + $0x18] sm:$0xff]  ;;  %s2451_s10 = scalar_lea.hbm %s2450_s29, 128  ;;  %p2456_p11 = scmp.lt.s32.totalorder %s2450_s29, %s3014_s7 }
  0x3e   : > { %444 = vmatpush.bf16.msra.mxu0 %v2025_v1  ;;  %2053 = vmatpush.bf16.msra.mxu2 %v2025_v1  ;;  %v371_v13 = vpack.c.bf16 %v360_v11, %v359_v10  ;;  %v361_v16 = vld [vmem:[%s2677_s15 + $0x50] sm:$0xff]  ;;  %v362_v17 = vld [vmem:[%s2677_s15 + $0x58] sm:$0xff]  ;;  %v368_v18 = vpack.c.bf16 %v354_v15, %v353_v14  ;;  %v355_v20 = vld [vmem:[%s2677_s15 + $0x20] sm:$0xff]  ;;  %p2452_p1 = scmp.ne.s32.totalorder %s2450_s29, %s2451_s10  ;;  %p2457_p9 = scmp.lt.s32.totalorder %s2455_s14, %s2451_s10 }
  0x3f   : > { %v372_v19 = vpack.c.bf16 %v362_v17, %v361_v16  ;;  %v356_v21 = vld [vmem:[%s2677_s15 + $0x28] sm:$0xff]  ;;  %v363_v22 = vld [vmem:[%s2677_s15 + $0x60] sm:$0xff]  ;;  %v357_v26 = vld [vmem:[%s2677_s15 + $0x30] sm:$0xff] }
  0x40   : > { %v364_v23 = vld [vmem:[%s2677_s15 + $0x68] sm:$0xff]  ;;  %v369_v24 = vpack.c.bf16 %v356_v21, %v355_v20  ;;  %v358_v27 = vld [vmem:[%s2677_s15 + $0x38] sm:$0xff]  ;;  %v365_v28 = vld [vmem:[%s2677_s15 + $0x70] sm:$0xff]  ;;  %p2453_p4 = pnand %p2452_p1, %p2643_p7  ;;  %p2458_p2 = por %p2457_p9, %p2456_p11 }
  0x41   : > { %v373_v25 = vpack.c.bf16 %v364_v23, %v363_v22  ;;  %v366_v29 = vld [vmem:[%s2677_s15 + $0x78] sm:$0xff]  ;;  %v370_v30 = vpack.c.bf16 %v358_v27, %v357_v26  ;;  %v2033_v33 = vld [vmem:[#allocation7 + $0x30] sm:$0xff]  ;;  %v2032_v34 = vld [vmem:[#allocation7 + $0x28] sm:$0xff]  ;;  %s1684_s15 = sshll.u32 %s2955_s20, 4  ;;  %s1685_s15 = int_to_ptr.vmem [resolvable:$true] %s1684_s15 }
  0x42   : > { %445 = vmatpush.bf16.msra.mxu0 %v2024_v2  ;;  %2054 = vmatpush.bf16.msra.mxu2 %v2024_v2  ;;  %v374_v31 = vpack.c.bf16 %v366_v29, %v365_v28  ;;  %v2034_v32 = vld [vmem:[#allocation7 + $0x38] sm:$0xff]  ;;  %v2031_v35 = vld [vmem:[#allocation7 + $0x20] sm:$0xff]  ;;  %v2029_v37 = vld [vmem:[#allocation7 + $0x10] sm:$0xff]  ;;  %p2454_p8 = pneg %p2453_p4 }
  0x43   : > { %696 = vmatpush.bf16.msra.mxu1 %v2034_v32  ;;  %2060 = vmatpush.bf16.msra.mxu3 %v2034_v32  ;;  %v2030_v36 = vld [vmem:[#allocation7 + $0x18] sm:$0xff]  ;;  %v2028_v38 = vld [vmem:[#allocation7 + $0x8] sm:$0xff]  ;;  %v2027_v39 = vld [vmem:[#allocation7] sm:$0xff] }
  0x44   : > { %v2710_v40 = vld [vmem:[%s3009_s2] ss:$0 sm:$0xff]  ;;  %p2459_p10 = pnand %p2458_p2, %p2454_p8 }
  0x46   : > { %446 = vmatpush.bf16.msra.mxu0 %v2023_v3  ;;  %2055 = vmatpush.bf16.msra.mxu2 %v2023_v3 }
  0x47   : > { %697 = vmatpush.bf16.msra.mxu1 %v2033_v33  ;;  %2061 = vmatpush.bf16.msra.mxu3 %v2033_v33 }
  0x4a   : > { %447 = vmatpush.bf16.msra.mxu0 %v2022_v4  ;;  %2056 = vmatpush.bf16.msra.mxu2 %v2022_v4 }
  0x4b   : > { %698 = vmatpush.bf16.msra.mxu1 %v2032_v34  ;;  %2062 = vmatpush.bf16.msra.mxu3 %v2032_v34 }
  0x4e   : > { %448 = vmatpush.bf16.msra.mxu0 %v2021_v5  ;;  %2057 = vmatpush.bf16.msra.mxu2 %v2021_v5 }
  0x4f   : > { %699 = vmatpush.bf16.msra.mxu1 %v2031_v35  ;;  %2063 = vmatpush.bf16.msra.mxu3 %v2031_v35 }
  0x52   : > { %449 = vmatpush.bf16.msra.mxu0 %v2020_v6  ;;  %2058 = vmatpush.bf16.msra.mxu2 %v2020_v6 }
  0x53   : > { %700 = vmatpush.bf16.msra.mxu1 %v2030_v36  ;;  %2064 = vmatpush.bf16.msra.mxu3 %v2030_v36 }
  0x56   : > { %450 = vmatpush.bf16.msra.mxu0 %v2019_v7  ;;  %2059 = vmatpush.bf16.msra.mxu2 %v2019_v7 }
  0x57   : > { %701 = vmatpush.bf16.msra.mxu1 %v2029_v37  ;;  %2065 = vmatpush.bf16.msra.mxu3 %v2029_v37 }
  0x59   : > { %451 = vmatmul.bf16.vlgmr.msra.gmra.mxu0 %v367_v12  ;;  %471 = vmatmul.bf16.vlgmr.msra.gmra.mxu2 %v371_v13 }
  0x5a   : > { %881 = vmatpush.bf16.msrb.mxu2 %v2034_v32 }
  0x5b   : > { %702 = vmatpush.bf16.msra.mxu1 %v2028_v38  ;;  %2066 = vmatpush.bf16.msra.mxu3 %v2028_v38 }
  0x5e   : > { %882 = vmatpush.bf16.msrb.mxu2 %v2033_v33 }
  0x5f   : > { %703 = vmatpush.bf16.msra.mxu1 %v2027_v39  ;;  %2067 = vmatpush.bf16.msra.mxu3 %v2027_v39 }
  0x62   : > { %883 = vmatpush.bf16.msrb.mxu2 %v2032_v34 }
  0x66   : > { %884 = vmatpush.bf16.msrb.mxu2 %v2031_v35 }
  0x69   : > { %456 = vmatmul.bf16.gmra.mxu0 %v368_v18  ;;  %476 = vmatmul.bf16.gmra.mxu2 %v372_v19 }
  0x6a   : > { %885 = vmatpush.bf16.msrb.mxu2 %v2030_v36 }
  0x6e   : > { %886 = vmatpush.bf16.msrb.mxu2 %v2029_v37 }
  0x72   : > { %887 = vmatpush.bf16.msrb.mxu2 %v2028_v38 }
  0x76   : > { %888 = vmatpush.bf16.msrb.mxu2 %v2027_v39 }
  0x79   : > { %461 = vmatmul.bf16.gmra.mxu0 %v369_v24  ;;  %481 = vmatmul.bf16.gmra.mxu2 %v373_v25 }
  0x89   : > { %466 = vmatmul.bf16.gmra.mxu0 %v370_v30  ;;  %486 = vmatmul.bf16.gmra.mxu2 %v374_v31 }
  0xd6   : > { %v452_v41 = vpop.f32.mrf.mxu0 }
  0xd7   : > { %v453_v42 = vadd.f32 %v2710_v40, %v452_v41 }
  0xd9   : > { %v492_v43 = vmin.f32 %v453_v42, 0.0  ;;  %vm572_vm0 = vcmp.gt.f32.partialorder %v453_v42, 0.0 }
  0xdb   : > { %v508_v44 = vmul.f32 1.442695, %v492_v43 }
  0xdc   : > { %v472_v45 = vpop.f32.mrf.mxu2 }
  0xdd   : > { %2155 = vpow2.f32 %v508_v44  ;;  %v473_v46 = vadd.f32 %v2710_v40, %v472_v45 }
  0xde   : > { %v454_v47 = vpop.f32.mrf.mxu0 }
  0xdf   : > { %v455_v48 = vadd.f32 %v2710_v40, %v454_v47  ;;  %v500_v49 = vmin.f32 %v473_v46, 0.0  ;;  %vm580_vm2 = vcmp.gt.f32.partialorder %v473_v46, 0.0 }
  0xe1   : > { %v493_v50 = vmin.f32 %v455_v48, 0.0  ;;  %v524_v51 = vmul.f32 1.442695, %v500_v49  ;;  %vm573_vm1 = vcmp.gt.f32.partialorder %v455_v48, 0.0 }
  0xe3   : > { %v2156_v52 = vpop.eup %2155  ;;  %v510_v53 = vmul.f32 1.442695, %v493_v50  ;;  %2157 = vpow2.f32 %v524_v51 }
  0xe4   : > { %v474_v54 = vpop.f32.mrf.mxu2  ;;  %v1836_v55 = vadd.f32 -1.0, %v2156_v52 }
  0xe5   : > { %2159 = vpow2.f32 %v510_v53  ;;  %v475_v56 = vadd.f32 %v2710_v40, %v474_v54 }
  0xe6   : > { %v457_v57 = vpop.f32.mrf.mxu0  ;;  %v556_v63 = vmul.f32 1.6732632, %v1836_v55 }
  0xe7   : > { %v2717_v58 = vadd.f32 %v2710_v40, %v457_v57  ;;  %v501_v59 = vmin.f32 %v475_v56, 0.0  ;;  %vm581_vm3 = vcmp.gt.f32.partialorder %v475_v56, 0.0 }
  0xe8   : > { %v588_v6 = vsel %vm572_vm0, %v453_v42, %v556_v63 }
  0xe9   : > { %v2158_v60 = vpop.eup %2157  ;;  %v494_v61 = vmin.f32 %v2717_v58, 0.0  ;;  %v526_v62 = vmul.f32 1.442695, %v501_v59  ;;  %v2725_v13 = vmul.f32 1.050701, %v588_v6  ;;  %vm574_vm4 = vcmp.gt.f32.partialorder %v2717_v58, 0.0 }
  0xea   : > { %v1844_v0 = vadd.f32 -1.0, %v2158_v60 }
  0xeb   : > { %v2160_v1 = vpop.eup %2159  ;;  %v512_v2 = vmul.f32 1.442695, %v494_v61  ;;  %2161 = vpow2.f32 %v526_v62 }
  0xec   : > { %v1837_v3 = vadd.f32 -1.0, %v2160_v1  ;;  %v477_v4 = vpop.f32.mrf.mxu2  ;;  %v564_v9 = vmul.f32 1.6732632, %v1844_v0 }
  0xed   : > { %2163 = vpow2.f32 %v512_v2  ;;  %v2721_v5 = vadd.f32 %v2710_v40, %v477_v4 }
  0xee   : > { %v459_v7 = vpop.f32.mrf.mxu0  ;;  %v557_v8 = vmul.f32 1.6732632, %v1837_v3  ;;  %v596_v19 = vsel %vm580_vm2, %v473_v46, %v564_v9 }
  0xef   : > { %v460_v10 = vadd.f32 %v2710_v40, %v459_v7  ;;  %v502_v11 = vmin.f32 %v2721_v5, 0.0  ;;  %v2732_v27 = vmul.f32 1.050701, %v596_v19  ;;  %vm582_vm6 = vcmp.gt.f32.partialorder %v2721_v5, 0.0 }
  0xf0   : > { %v589_v12 = vsel %vm573_vm1, %v455_v48, %v557_v8 }
  0xf1   : > { %v2162_v14 = vpop.eup %2161  ;;  %v495_v15 = vmin.f32 %v460_v10, 0.0  ;;  %v528_v16 = vmul.f32 1.442695, %v502_v11  ;;  %v2727_v17 = vmul.f32 1.050701, %v589_v12  ;;  %vm575_vm5 = vcmp.gt.f32.partialorder %v460_v10, 0.0 }
  0xf2   : > { %v1845_v18 = vadd.f32 -1.0, %v2162_v14 }
  0xf3   : > { %v2164_v20 = vpop.eup %2163  ;;  %v514_v21 = vmul.f32 1.442695, %v495_v15  ;;  %2165 = vpow2.f32 %v528_v16  ;;  %v637_v22 = vpack.c.bf16 %v2727_v17, %v2725_v13 }
  0xf4   : > { %v479_v23 = vpop.f32.mrf.mxu2  ;;  %v565_v24 = vmul.f32 1.6732632, %v1845_v18  ;;  %v1838_v25 = vadd.f32 -1.0, %v2164_v20 }
  0xf5   : > { %2167 = vpow2.f32 %v514_v21  ;;  %704 = vmatmul.bf16.vlgmr.msra.gmra.mxu1 %v637_v22  ;;  %v480_v26 = vadd.f32 %v2710_v40, %v479_v23 }
  0xf6   : > { %v462_v28 = vpop.f32.mrf.mxu0  ;;  %v597_v29 = vsel %vm581_vm3, %v475_v56, %v565_v24  ;;  %v558_v37 = vmul.f32 1.6732632, %v1838_v25 }
  0xf7   : > { %v2735_v30 = vadd.f32 %v2710_v40, %v462_v28  ;;  %v503_v31 = vmin.f32 %v480_v26, 0.0  ;;  %v2737_v32 = vmul.f32 1.050701, %v597_v29  ;;  %vm583_vm7 = vcmp.gt.f32.partialorder %v480_v26, 0.0 }
  0xf8   : > { %v590_v45 = vsel %vm574_vm4, %v2717_v58, %v558_v37 }
  0xf9   : > { %v2166_v33 = vpop.eup %2165  ;;  %v496_v34 = vmin.f32 %v2735_v30, 0.0  ;;  %v530_v35 = vmul.f32 1.442695, %v503_v31  ;;  %v641_v36 = vpack.c.bf16 %v2737_v32, %v2732_v27  ;;  %v2750_v52 = vmul.f32 1.050701, %v590_v45 }
  0xfa   : > { %v1846_v38 = vadd.f32 -1.0, %v2166_v33  ;;  %vm576_vm8 = vcmp.gt.f32.partialorder %v2735_v30, 0.0 }
  0xfb   : > { %v2168_v39 = vpop.eup %2167  ;;  %v516_v41 = vmul.f32 1.442695, %v496_v34  ;;  %2169 = vpow2.f32 %v530_v35  ;;  %724 = vmatmul.bf16.vlgmr.msra.gmra.mxu3 %v641_v36 }
  0xfc   : > { %v1839_v42 = vadd.f32 -1.0, %v2168_v39  ;;  %v482_v43 = vpop.f32.mrf.mxu2  ;;  %v566_v48 = vmul.f32 1.6732632, %v1846_v38 }
  0xfd   : > { %2171 = vpow2.f32 %v516_v41  ;;  %v2744_v44 = vadd.f32 %v2710_v40, %v482_v43 }
  0xfe   : > { %v464_v46 = vpop.f32.mrf.mxu0  ;;  %v559_v47 = vmul.f32 1.6732632, %v1839_v42  ;;  %v598_v58 = vsel %vm582_vm6, %v2721_v5, %v566_v48 }
  0xff   : > { %v465_v49 = vadd.f32 %v2710_v40, %v464_v46  ;;  %v504_v50 = vmin.f32 %v2744_v44, 0.0  ;;  %v2758_v2 = vmul.f32 1.050701, %v598_v58  ;;  %vm584_vm10 = vcmp.gt.f32.partialorder %v2744_v44, 0.0 }
 0x100   : > { %v591_v51 = vsel %vm575_vm5, %v460_v10, %v559_v47 }
 0x101   : > { %v2170_v53 = vpop.eup %2169  ;;  %v497_v54 = vmin.f32 %v465_v49, 0.0  ;;  %v532_v55 = vmul.f32 1.442695, %v504_v50  ;;  %v2752_v56 = vmul.f32 1.050701, %v591_v51  ;;  %vm577_vm9 = vcmp.gt.f32.partialorder %v465_v49, 0.0 }
 0x102   : > { %v1847_v57 = vadd.f32 -1.0, %v2170_v53 }
 0x103   : > { %v2172_v59 = vpop.eup %2171  ;;  %v518_v60 = vmul.f32 1.442695, %v497_v54  ;;  %2173 = vpow2.f32 %v532_v55  ;;  %v638_v61 = vpack.c.bf16 %v2752_v56, %v2750_v52 }
 0x104   : > { %v484_v62 = vpop.f32.mrf.mxu2  ;;  %v567_v63 = vmul.f32 1.6732632, %v1847_v57  ;;  %v1840_v0 = vadd.f32 -1.0, %v2172_v59 }
 0x105   : > { %2175 = vpow2.f32 %v518_v60  ;;  %709 = vmatmul.bf16.gmra.mxu1 %v638_v61  ;;  %v485_v1 = vadd.f32 %v2710_v40, %v484_v62 }
 0x106   : > { %v467_v3 = vpop.f32.mrf.mxu0  ;;  %v599_v4 = vsel %vm583_vm7, %v480_v26, %v567_v63  ;;  %v560_v12 = vmul.f32 1.6732632, %v1840_v0 }
 0x107   : > { %v468_v5 = vadd.f32 %v2710_v40, %v467_v3  ;;  %v505_v6 = vmin.f32 %v485_v1, 0.0  ;;  %v2761_v7 = vmul.f32 1.050701, %v599_v4  ;;  %vm585_vm11 = vcmp.gt.f32.partialorder %v485_v1, 0.0 }
 0x108   : > { %v592_v21 = vsel %vm576_vm8, %v2735_v30, %v560_v12 }
 0x109   : > { %v2174_v8 = vpop.eup %2173  ;;  %v498_v9 = vmin.f32 %v468_v5, 0.0  ;;  %v534_v10 = vmul.f32 1.442695, %v505_v6  ;;  %v642_v11 = vpack.c.bf16 %v2761_v7, %v2758_v2  ;;  %v2770_v29 = vmul.f32 1.050701, %v592_v21 }
 0x10a   : > { %v1848_v14 = vadd.f32 -1.0, %v2174_v8  ;;  %vm578_vm12 = vcmp.gt.f32.partialorder %v468_v5, 0.0 }
 0x10b   : > { %v2176_v15 = vpop.eup %2175  ;;  %v520_v16 = vmul.f32 1.442695, %v498_v9  ;;  %2177 = vpow2.f32 %v534_v10  ;;  %729 = vmatmul.bf16.gmra.mxu3 %v642_v11  ;;  %v2799_v10 = vld [vmem:[%s3011_s4] ss:$0 sm:$0xff] }
 0x10c   : > { %v1841_v18 = vadd.f32 -1.0, %v2176_v15  ;;  %v487_v19 = vpop.f32.mrf.mxu2  ;;  %v568_v24 = vmul.f32 1.6732632, %v1848_v14 }
 0x10d   : > { %2179 = vpow2.f32 %v520_v16  ;;  %v488_v20 = vadd.f32 %v2710_v40, %v487_v19 }
 0x10e   : > { %v469_v22 = vpop.f32.mrf.mxu0  ;;  %v561_v23 = vmul.f32 1.6732632, %v1841_v18  ;;  %v600_v30 = vsel %vm584_vm10, %v2744_v44, %v568_v24 }
 0x10f   : > { %v470_v25 = vadd.f32 %v2710_v40, %v469_v22  ;;  %v506_v26 = vmin.f32 %v488_v20, 0.0  ;;  %v2778_v45 = vmul.f32 1.050701, %v600_v30  ;;  %vm586_vm14 = vcmp.gt.f32.partialorder %v488_v20, 0.0 }
 0x110   : > { %v593_v28 = vsel %vm577_vm9, %v465_v49, %v561_v23 }
 0x111   : > { %v2178_v31 = vpop.eup %2177  ;;  %v499_v33 = vmin.f32 %v470_v25, 0.0  ;;  %v536_v34 = vmul.f32 1.442695, %v506_v26  ;;  %v2772_v35 = vmul.f32 1.050701, %v593_v28  ;;  %vm579_vm13 = vcmp.gt.f32.partialorder %v470_v25, 0.0 }
 0x112   : > { %v1849_v36 = vadd.f32 -1.0, %v2178_v31 }
 0x113   : > { %v2180_v37 = vpop.eup %2179  ;;  %v522_v38 = vmul.f32 1.442695, %v499_v33  ;;  %2181 = vpow2.f32 %v536_v34  ;;  %v639_v39 = vpack.c.bf16 %v2772_v35, %v2770_v29 }
 0x114   : > { %v489_v41 = vpop.f32.mrf.mxu2  ;;  %v569_v42 = vmul.f32 1.6732632, %v1849_v36  ;;  %v1842_v46 = vadd.f32 -1.0, %v2180_v37 }
 0x115   : > { %2183 = vpow2.f32 %v522_v38  ;;  %714 = vmatmul.bf16.gmra.mxu1 %v639_v39  ;;  %v490_v43 = vadd.f32 %v2710_v40, %v489_v41 }
 0x116   : > { %v601_v47 = vsel %vm585_vm11, %v485_v1, %v569_v42  ;;  %v562_v54 = vmul.f32 1.6732632, %v1842_v46 }
 0x117   : > { %v507_v48 = vmin.f32 %v490_v43, 0.0  ;;  %v2780_v49 = vmul.f32 1.050701, %v601_v47  ;;  %vm587_vm15 = vcmp.gt.f32.partialorder %v490_v43, 0.0 }
 0x118   : > { %v594_v58 = vsel %vm578_vm12, %v468_v5, %v562_v54 }
 0x119   : > { %v2182_v44 = vpop.eup %2181  ;;  %v538_v50 = vmul.f32 1.442695, %v507_v48  ;;  %v643_v51 = vpack.c.bf16 %v2780_v49, %v2778_v45  ;;  %v2784_v62 = vmul.f32 1.050701, %v594_v58 }
 0x11a   : > { %v1850_v53 = vadd.f32 -1.0, %v2182_v44 }
 0x11b   : > { %v2184_v55 = vpop.eup %2183  ;;  %2185 = vpow2.f32 %v538_v50  ;;  %734 = vmatmul.bf16.gmra.mxu3 %v643_v51 }
 0x11c   : > { %v1843_v57 = vadd.f32 -1.0, %v2184_v55  ;;  %v570_v59 = vmul.f32 1.6732632, %v1850_v53 }
 0x11e   : > { %v563_v40 = vmul.f32 1.6732632, %v1843_v57  ;;  %v602_v1 = vsel %vm586_vm14, %v488_v20, %v570_v59 }
 0x11f   : > { %v2790_v6 = vmul.f32 1.050701, %v602_v1 }
 0x120   : > { %v595_v60 = vsel %vm579_vm13, %v470_v25, %v563_v40 }
 0x121   : > { %v2186_v61 = vpop.eup %2185  ;;  %v2786_v63 = vmul.f32 1.050701, %v595_v60 }
 0x122   : > { %v1851_v0 = vadd.f32 -1.0, %v2186_v61 }
 0x123   : > { %v640_v3 = vpack.c.bf16 %v2786_v63, %v2784_v62 }
 0x124   : > { %v571_v4 = vmul.f32 1.6732632, %v1851_v0 }
 0x125   : > { %719 = vmatmul.bf16.gmra.mxu1 %v640_v3 }
 0x126   : > { %v603_v5 = vsel %vm587_vm15, %v490_v43, %v571_v4 }
 0x127   : > { %v2792_v8 = vmul.f32 1.050701, %v603_v5 }
 0x129   : > { %v644_v9 = vpack.c.bf16 %v2792_v8, %v2790_v6 }
 0x12b   : > { %739 = vmatmul.bf16.gmra.mxu3 %v644_v9 }
 0x172   : > { %v705_v11 = vpop.f32.mrf.mxu1 }
 0x173   : > { %v706_v12 = vadd.f32 %v2799_v10, %v705_v11 }
 0x175   : > { %v745_v14 = vmin.f32 %v706_v12, 0.0  ;;  %vm825_vm0 = vcmp.gt.f32.partialorder %v706_v12, 0.0 }
 0x177   : > { %v761_v15 = vmul.f32 1.442695, %v745_v14 }
 0x179   : > { %2187 = vpow2.f32 %v761_v15 }
 0x17a   : > { %v707_v16 = vpop.f32.mrf.mxu1 }
 0x17b   : > { %v708_v18 = vadd.f32 %v2799_v10, %v707_v16 }
 0x17d   : > { %v746_v19 = vmin.f32 %v708_v18, 0.0  ;;  %vm826_vm1 = vcmp.gt.f32.partialorder %v708_v18, 0.0 }
 0x17e   : > { %v725_v44 = vpop.f32.mrf.mxu3 }
 0x17f   : > { %v2188_v20 = vpop.eup %2187  ;;  %v763_v21 = vmul.f32 1.442695, %v746_v19 }
 0x180   : > { %v1884_v22 = vadd.f32 -1.0, %v2188_v20 }
 0x181   : > { %2189 = vpow2.f32 %v763_v21 }
 0x182   : > { %v710_v23 = vpop.f32.mrf.mxu1  ;;  %v809_v26 = vmul.f32 1.6732632, %v1884_v22 }
 0x183   : > { %v711_v24 = vadd.f32 %v2799_v10, %v710_v23 }
 0x184   : > { %v841_v34 = vsel %vm825_vm0, %v706_v12, %v809_v26 }
 0x185   : > { %v747_v25 = vmin.f32 %v711_v24, 0.0  ;;  %v857_v39 = vmul.f32 1.050701, %v841_v34  ;;  %vm827_vm2 = vcmp.gt.f32.partialorder %v711_v24, 0.0 }
 0x186   : > { %v727_v0 = vpop.f32.mrf.mxu3 }
 0x187   : > { %v2190_v28 = vpop.eup %2189  ;;  %v765_v31 = vmul.f32 1.442695, %v747_v25 }
 0x188   : > { %v1885_v33 = vadd.f32 -1.0, %v2190_v28 }
 0x189   : > { %2191 = vpow2.f32 %v765_v31  ;;  %v728_v31 = vadd.f32 %v2799_v10, %v727_v0 }
 0x18a   : > { %v810_v36 = vmul.f32 1.6732632, %v1885_v33  ;;  %v712_v30 = vpop.f32.mrf.mxu1 }
 0x18b   : > { %v713_v37 = vadd.f32 %v2799_v10, %v712_v30  ;;  %vm834_vm9 = vcmp.gt.f32.partialorder %v728_v31, 0.0 }
 0x18c   : > { %v842_v38 = vsel %vm826_vm1, %v708_v18, %v810_v36 }
 0x18d   : > { %v858_v41 = vmul.f32 1.050701, %v842_v38  ;;  %v748_v42 = vmin.f32 %v713_v37, 0.0  ;;  %vm828_vm3 = vcmp.gt.f32.partialorder %v713_v37, 0.0 }
 0x18e   : > { %v730_v19 = vpop.f32.mrf.mxu3 }
 0x18f   : > { %v2192_v43 = vpop.eup %2191  ;;  %v767_v46 = vmul.f32 1.442695, %v748_v42  ;;  %v873_v47 = vpack.c.bf16 %v858_v41, %v857_v39  ;;  %v754_v41 = vmin.f32 %v728_v31, 0.0 }
 0x190   : > { %v1886_v48 = vadd.f32 -1.0, %v2192_v43 }
 0x191   : > { %2193 = vpow2.f32 %v767_v46  ;;  %889 = vmatmul.bf16.vlgmr.msrb.gmra.mxu2 %v873_v47 }
 0x192   : > { %v715_v50 = vpop.f32.mrf.mxu1  ;;  %v811_v54 = vmul.f32 1.6732632, %v1886_v48 }
 0x193   : > { %v716_v51 = vadd.f32 %v2799_v10, %v715_v50 }
 0x194   : > { %v843_v60 = vsel %vm827_vm2, %v711_v24, %v811_v54  ;;  %v726_v24 = vadd.f32 %v2799_v10, %v725_v44  ;;  %v779_v44 = vmul.f32 1.442695, %v754_v41  ;;  %v731_v54 = vadd.f32 %v2799_v10, %v730_v19 }
 0x195   : > { %v749_v53 = vmin.f32 %v716_v51, 0.0  ;;  %v859_v4 = vmul.f32 1.050701, %v843_v60  ;;  %vm829_vm4 = vcmp.gt.f32.partialorder %v716_v51, 0.0 }
 0x196   : > { %v753_v38 = vmin.f32 %v726_v24, 0.0  ;;  %v732_v46 = vpop.f32.mrf.mxu3  ;;  %vm833_vm8 = vcmp.gt.f32.partialorder %v726_v24, 0.0  ;;  %vm835_vm10 = vcmp.gt.f32.partialorder %v731_v54, 0.0 }
 0x197   : > { %v2194_v55 = vpop.eup %2193  ;;  %v769_v57 = vmul.f32 1.442695, %v749_v53 }
 0x198   : > { %v1887_v40 = vadd.f32 -1.0, %v2194_v55  ;;  %v777_v47 = vmul.f32 1.442695, %v753_v38 }
 0x199   : > { %2195 = vpow2.f32 %v769_v57 }
 0x19a   : > { %v717_v58 = vpop.f32.mrf.mxu1  ;;  %v812_v59 = vmul.f32 1.6732632, %v1887_v40 }
 0x19b   : > { %v718_v61 = vadd.f32 %v2799_v10, %v717_v58  ;;  %v733_v58 = vadd.f32 %v2799_v10, %v732_v46 }
 0x19c   : > { %v844_v1 = vsel %vm828_vm3, %v713_v37, %v812_v59 }
 0x19d   : > { %v750_v3 = vmin.f32 %v718_v61, 0.0  ;;  %v860_v5 = vmul.f32 1.050701, %v844_v1  ;;  %vm830_vm5 = vcmp.gt.f32.partialorder %v718_v61, 0.0  ;;  %vm836_vm11 = vcmp.gt.f32.partialorder %v733_v58, 0.0 }
 0x19e   : > { %v735_v55 = vpop.f32.mrf.mxu3 }
 0x19f   : > { %v2196_v9 = vpop.eup %2195  ;;  %v771_v11 = vmul.f32 1.442695, %v750_v3  ;;  %v874_v12 = vpack.c.bf16 %v860_v5, %v859_v4  ;;  %v755_v3 = vmin.f32 %v731_v54, 0.0  ;;  %v756_v4 = vmin.f32 %v733_v58, 0.0 }
 0x1a0   : > { %v1888_v14 = vadd.f32 -1.0, %v2196_v9 }
 0x1a1   : > { %2197 = vpow2.f32 %v771_v11  ;;  %894 = vmatmul.bf16.gmra.mxu2 %v874_v12  ;;  %v781_v12 = vmul.f32 1.442695, %v755_v3 }
 0x1a2   : > { %v720_v15 = vpop.f32.mrf.mxu1  ;;  %v813_v20 = vmul.f32 1.6732632, %v1888_v14  ;;  %v783_v14 = vmul.f32 1.442695, %v756_v4 }
 0x1a3   : > { %v721_v16 = vadd.f32 %v2799_v10, %v720_v15 }
 0x1a4   : > { %v845_v28 = vsel %vm829_vm4, %v716_v51, %v813_v20 }
 0x1a5   : > { %v751_v18 = vmin.f32 %v721_v16, 0.0  ;;  %v861_v30 = vmul.f32 1.050701, %v845_v28  ;;  %vm831_vm6 = vcmp.gt.f32.partialorder %v721_v16, 0.0 }
 0x1a6   : > { %v737_v15 = vpop.f32.mrf.mxu3 }
 0x1a7   : > { %v2198_v21 = vpop.eup %2197  ;;  %v773_v22 = vmul.f32 1.442695, %v751_v18 }
 0x1a8   : > { %v1889_v23 = vadd.f32 -1.0, %v2198_v21  ;;  %v736_v21 = vadd.f32 %v2799_v10, %v735_v55 }
 0x1a9   : > { %2199 = vpow2.f32 %v773_v22  ;;  %v738_v22 = vadd.f32 %v2799_v10, %v737_v15 }
 0x1aa   : > { %v722_v25 = vpop.f32.mrf.mxu1  ;;  %v814_v26 = vmul.f32 1.6732632, %v1889_v23  ;;  %vm837_vm12 = vcmp.gt.f32.partialorder %v736_v21, 0.0 }
 0x1ab   : > { %v723_v33 = vadd.f32 %v2799_v10, %v722_v25  ;;  %vm838_vm13 = vcmp.gt.f32.partialorder %v738_v22, 0.0 }
 0x1ac   : > { %v846_v34 = vsel %vm830_vm5, %v718_v61, %v814_v26 }
 0x1ad   : > { %v752_v36 = vmin.f32 %v723_v33, 0.0  ;;  %v862_v37 = vmul.f32 1.050701, %v846_v34  ;;  %vm832_vm7 = vcmp.gt.f32.partialorder %v723_v33, 0.0 }
 0x1ae   : > { %v740_v34 = vpop.f32.mrf.mxu3 }
 0x1af   : > { %v2200_v39 = vpop.eup %2199  ;;  %v775_v42 = vmul.f32 1.442695, %v752_v36  ;;  %v875_v43 = vpack.c.bf16 %v862_v37, %v861_v30  ;;  %v758_v36 = vmin.f32 %v738_v22, 0.0 }
 0x1b0   : > { %v1890_v48 = vadd.f32 -1.0, %v2200_v39  ;;  %v2042_v39 = vld [vmem:[#allocation7 + $0x78] sm:$0xff] }
 0x1b1   : > { %2201 = vpow2.f32 %v775_v42  ;;  %899 = vmatmul.bf16.gmra.mxu2 %v875_v43  ;;  %v787_v42 = vmul.f32 1.442695, %v758_v36  ;;  %1152 = vmatpush.bf16.msrb.mxu3 %v2042_v39 }
 0x1b2   : > { %2203 = vpow2.f32 %v777_v47  ;;  %v815_v50 = vmul.f32 1.6732632, %v1890_v48  ;;  %1337 = vmatpush.bf16.msrb.mxu0 %v2042_v39 }
 0x1b3   : > { %2205 = vpow2.f32 %v779_v44  ;;  %v741_v44 = vadd.f32 %v2799_v10, %v740_v34 }
 0x1b4   : > { %v847_v40 = vsel %vm831_vm6, %v721_v16, %v815_v50  ;;  %2207 = vpow2.f32 %v781_v12 }
 0x1b5   : > { %v863_v0 = vmul.f32 1.050701, %v847_v40  ;;  %2209 = vpow2.f32 %v783_v14  ;;  %v759_v40 = vmin.f32 %v741_v44, 0.0  ;;  %vm839_vm14 = vcmp.gt.f32.partialorder %v741_v44, 0.0 }
 0x1b6   : > { %v742_v46 = vpop.f32.mrf.mxu3 }
 0x1b7   : > { %v2202_v51 = vpop.eup %2201  ;;  %v743_v50 = vadd.f32 %v2799_v10, %v742_v46  ;;  %v789_v3 = vmul.f32 1.442695, %v759_v40 }
 0x1b8   : > { %v1891_v53 = vadd.f32 -1.0, %v2202_v51  ;;  %v2204_v59 = vpop.eup %2203 }
 0x1b9   : > { %v2206_v61 = vpop.eup %2205  ;;  %v1892_v9 = vadd.f32 -1.0, %v2204_v59  ;;  %v760_v59 = vmin.f32 %v743_v50, 0.0  ;;  %vm840_vm15 = vcmp.gt.f32.partialorder %v743_v50, 0.0 }
 0x1ba   : > { %v816_v57 = vmul.f32 1.6732632, %v1891_v53  ;;  %v1893_v11 = vadd.f32 -1.0, %v2206_v61  ;;  %v2208_v26 = vpop.eup %2207 }
 0x1bb   : > { %v817_v18 = vmul.f32 1.6732632, %v1892_v9  ;;  %v2210_v28 = vpop.eup %2209  ;;  %v1894_v37 = vadd.f32 -1.0, %v2208_v26  ;;  %v791_v4 = vmul.f32 1.442695, %v760_v59 }
 0x1bc   : > { %v848_v60 = vsel %vm832_vm7, %v723_v33, %v816_v57  ;;  %v818_v19 = vmul.f32 1.6732632, %v1893_v11  ;;  %v757_v33 = vmin.f32 %v736_v21, 0.0  ;;  %v1895_v38 = vadd.f32 -1.0, %v2210_v28 }
 0x1bd   : > { %v864_v1 = vmul.f32 1.050701, %v848_v60  ;;  %v849_v16 = vsel %vm833_vm8, %v726_v24, %v817_v18  ;;  %v2041_v24 = vld [vmem:[#allocation7 + $0x70] sm:$0xff] }
 0x1be   : > { %v850_v20 = vsel %vm834_vm9, %v728_v31, %v818_v19  ;;  %v865_v23 = vmul.f32 1.050701, %v849_v16  ;;  %v785_v41 = vmul.f32 1.442695, %v757_v33  ;;  %v819_v31 = vmul.f32 1.6732632, %v1894_v37  ;;  %1153 = vmatpush.bf16.msrb.mxu3 %v2041_v24  ;;  %1338 = vmatpush.bf16.msrb.mxu0 %v2041_v24 }
 0x1bf   : > { %v876_v5 = vpack.c.bf16 %v864_v1, %v863_v0  ;;  %v866_v25 = vmul.f32 1.050701, %v850_v20  ;;  %v820_v43 = vmul.f32 1.6732632, %v1895_v38  ;;  %v2040_v1 = vld [vmem:[#allocation7 + $0x68] sm:$0xff]  ;;  %v2035_v37 = vld [vmem:[#allocation7 + $0x40] sm:$0xff] }
 0x1c0   : > { %2211 = vpow2.f32 %v785_v41  ;;  %v851_v47 = vsel %vm835_vm10, %v731_v54, %v819_v31  ;;  %v2039_v54 = vld [vmem:[#allocation7 + $0x60] sm:$0xff] }
 0x1c1   : > { %904 = vmatmul.bf16.gmra.mxu2 %v876_v5  ;;  %v877_v30 = vpack.c.bf16 %v866_v25, %v865_v23  ;;  %2213 = vpow2.f32 %v787_v42  ;;  %v852_v48 = vsel %vm836_vm11, %v733_v58, %v820_v43  ;;  %v867_v51 = vmul.f32 1.050701, %v851_v47 }
 0x1c2   : > { %v868_v53 = vmul.f32 1.050701, %v852_v48  ;;  %1154 = vmatpush.bf16.msrb.mxu3 %v2040_v1  ;;  %1339 = vmatpush.bf16.msrb.mxu0 %v2040_v1  ;;  %2215 = vpow2.f32 %v789_v3 }
 0x1c3   : > { %2217 = vpow2.f32 %v791_v4 }
 0x1c4   : > { %v878_v60 = vpack.c.bf16 %v868_v53, %v867_v51 }
 0x1c6   : > { %v2212_v55 = vpop.eup %2211  ;;  %1155 = vmatpush.bf16.msrb.mxu3 %v2039_v54  ;;  %1340 = vmatpush.bf16.msrb.mxu0 %v2039_v54 }
 0x1c7   : > { %v2214_v57 = vpop.eup %2213  ;;  %v1896_v61 = vadd.f32 -1.0, %v2212_v55 }
 0x1c8   : > { %v1897_v0 = vadd.f32 -1.0, %v2214_v57  ;;  %v2216_v15 = vpop.eup %2215 }
 0x1c9   : > { %v821_v58 = vmul.f32 1.6732632, %v1896_v61  ;;  %v2218_v18 = vpop.eup %2217  ;;  %v1898_v16 = vadd.f32 -1.0, %v2216_v15 }
 0x1ca   : > { %v822_v5 = vmul.f32 1.6732632, %v1897_v0  ;;  %v1899_v20 = vadd.f32 -1.0, %v2218_v18 }
 0x1cb   : > { %v853_v9 = vsel %vm837_vm12, %v736_v21, %v821_v58  ;;  %v823_v23 = vmul.f32 1.6732632, %v1898_v16  ;;  %v2038_v21 = vld [vmem:[#allocation7 + $0x58] sm:$0xff] }
 0x1cc   : > { %v854_v11 = vsel %vm838_vm13, %v738_v22, %v822_v5  ;;  %v869_v12 = vmul.f32 1.050701, %v853_v9  ;;  %v824_v25 = vmul.f32 1.6732632, %v1899_v20  ;;  %1156 = vmatpush.bf16.msrb.mxu3 %v2038_v21  ;;  %1341 = vmatpush.bf16.msrb.mxu0 %v2038_v21  ;;  %v2037_v22 = vld [vmem:[#allocation7 + $0x50] sm:$0xff] }
 0x1cd   : > { %v870_v14 = vmul.f32 1.050701, %v854_v11  ;;  %v855_v26 = vsel %vm839_vm14, %v741_v44, %v823_v23 }
 0x1ce   : > { %v856_v28 = vsel %vm840_vm15, %v743_v50, %v824_v25  ;;  %v871_v33 = vmul.f32 1.050701, %v855_v26 }
 0x1cf   : > { %v879_v19 = vpack.c.bf16 %v870_v14, %v869_v12  ;;  %v872_v34 = vmul.f32 1.050701, %v856_v28 }
 0x1d0   : > { %1157 = vmatpush.bf16.msrb.mxu3 %v2037_v22  ;;  %1342 = vmatpush.bf16.msrb.mxu0 %v2037_v22 }
 0x1d1   : > { %909 = vmatmul.bf16.gmra.mxu2 %v877_v30  ;;  %v880_v36 = vpack.c.bf16 %v872_v34, %v871_v33  ;;  %v2036_v30 = vld [vmem:[#allocation7 + $0x48] sm:$0xff] }
 0x1d4   : > { %1158 = vmatpush.bf16.msrb.mxu3 %v2036_v30  ;;  %1343 = vmatpush.bf16.msrb.mxu0 %v2036_v30 }
 0x1d8   : > { %1159 = vmatpush.bf16.msrb.mxu3 %v2035_v37  ;;  %1344 = vmatpush.bf16.msrb.mxu0 %v2035_v37 }
 0x1e1   : > { %914 = vmatmul.bf16.gmra.mxu2 %v878_v60 }
 0x1f1   : > { %919 = vmatmul.bf16.gmra.mxu2 %v879_v19 }
 0x201   : > { %924 = vmatmul.bf16.gmra.mxu2 %v880_v36 }
 0x214   : > { %v890_v38 = vpop.f32.mrf.mxu2 }
 0x215   : > { %v891_v39 = vadd.f32 %v2799_v10, %v890_v38 }
 0x217   : > { %v930_v41 = vadd.f32 %v891_v39, %v2725_v13 }
 0x219   : > { %v946_v42 = vmin.f32 %v930_v41, 0.0  ;;  %vm1026_vm0 = vcmp.gt.f32.partialorder %v930_v41, 0.0 }
 0x21b   : > { %v962_v24 = vmul.f32 1.442695, %v946_v42 }
 0x21c   : > { %v892_v31 = vpop.f32.mrf.mxu2 }
 0x21d   : > { %2219 = vpow2.f32 %v962_v24  ;;  %v893_v43 = vadd.f32 %v2799_v10, %v892_v31 }
 0x21f   : > { %v931_v46 = vadd.f32 %v893_v43, %v2727_v17 }
 0x221   : > { %v947_v47 = vmin.f32 %v931_v46, 0.0  ;;  %vm1027_vm1 = vcmp.gt.f32.partialorder %v931_v46, 0.0 }
 0x223   : > { %v2220_v48 = vpop.eup %2219  ;;  %v964_v44 = vmul.f32 1.442695, %v947_v47 }
 0x224   : > { %v895_v50 = vpop.f32.mrf.mxu2  ;;  %v1900_v53 = vadd.f32 -1.0, %v2220_v48 }
 0x225   : > { %2221 = vpow2.f32 %v964_v44  ;;  %v896_v51 = vadd.f32 %v2799_v10, %v895_v50 }
 0x226   : > { %v1010_v13 = vmul.f32 1.6732632, %v1900_v53 }
 0x227   : > { %v932_v55 = vadd.f32 %v896_v51, %v2750_v52 }
 0x228   : > { %v1042_v1 = vsel %vm1026_vm0, %v930_v41, %v1010_v13 }
 0x229   : > { %v948_v57 = vmin.f32 %v932_v55, 0.0  ;;  %v2825_v58 = vmul.f32 1.050701, %v1042_v1  ;;  %vm1028_vm2 = vcmp.gt.f32.partialorder %v932_v55, 0.0 }
 0x22b   : > { %v2222_v40 = vpop.eup %2221  ;;  %v966_v59 = vmul.f32 1.442695, %v948_v57 }
 0x22c   : > { %v1901_v60 = vadd.f32 -1.0, %v2222_v40  ;;  %v897_v61 = vpop.f32.mrf.mxu2 }
 0x22d   : > { %2223 = vpow2.f32 %v966_v59  ;;  %v898_v17 = vadd.f32 %v2799_v10, %v897_v61 }
 0x22e   : > { %v1011_v0 = vmul.f32 1.6732632, %v1901_v60 }
 0x22f   : > { %v933_v3 = vadd.f32 %v898_v17, %v2752_v56 }
 0x230   : > { %v1043_v4 = vsel %vm1027_vm1, %v931_v46, %v1011_v0 }
 0x231   : > { %v949_v54 = vmin.f32 %v933_v3, 0.0  ;;  %v2827_v52 = vmul.f32 1.050701, %v1043_v4  ;;  %vm1029_vm3 = vcmp.gt.f32.partialorder %v933_v3, 0.0 }
 0x233   : > { %v2224_v5 = vpop.eup %2223  ;;  %v968_v9 = vmul.f32 1.442695, %v949_v54  ;;  %v1093_v11 = vpack.c.bf16 %v2827_v52, %v2825_v58 }
 0x234   : > { %v900_v12 = vpop.f32.mrf.mxu2  ;;  %v1902_v15 = vadd.f32 -1.0, %v2224_v5 }
 0x235   : > { %2225 = vpow2.f32 %v968_v9  ;;  %v901_v14 = vadd.f32 %v2799_v10, %v900_v12  ;;  %1160 = vmatmul.bf16.vlgmr.msrb.gmra.mxu3 %v1093_v11 }
 0x236   : > { %v1012_v19 = vmul.f32 1.6732632, %v1902_v15 }
 0x237   : > { %v934_v18 = vadd.f32 %v901_v14, %v2770_v29 }
 0x238   : > { %v1044_v33 = vsel %vm1028_vm2, %v932_v55, %v1012_v19 }
 0x239   : > { %v950_v56 = vmin.f32 %v934_v18, 0.0  ;;  %v2835_v22 = vmul.f32 1.050701, %v1044_v33  ;;  %vm1030_vm4 = vcmp.gt.f32.partialorder %v934_v18, 0.0 }
 0x23b   : > { %v2226_v16 = vpop.eup %2225  ;;  %v970_v20 = vmul.f32 1.442695, %v950_v56 }
 0x23c   : > { %v902_v23 = vpop.f32.mrf.mxu2  ;;  %v1903_v25 = vadd.f32 -1.0, %v2226_v16 }
 0x23d   : > { %2227 = vpow2.f32 %v970_v20  ;;  %v903_v26 = vadd.f32 %v2799_v10, %v902_v23 }
 0x23e   : > { %v1013_v28 = vmul.f32 1.6732632, %v1903_v25 }
 0x23f   : > { %v935_v34 = vadd.f32 %v903_v26, %v2772_v35 }
 0x240   : > { %v1045_v36 = vsel %vm1029_vm3, %v933_v3, %v1013_v28 }
 0x241   : > { %v951_v21 = vmin.f32 %v935_v34, 0.0  ;;  %v2837_v29 = vmul.f32 1.050701, %v1045_v36  ;;  %vm1031_vm5 = vcmp.gt.f32.partialorder %v935_v34, 0.0 }
 0x243   : > { %v2228_v30 = vpop.eup %2227  ;;  %v972_v37 = vmul.f32 1.442695, %v951_v21  ;;  %v1094_v38 = vpack.c.bf16 %v2837_v29, %v2835_v22 }
 0x244   : > { %v905_v39 = vpop.f32.mrf.mxu2  ;;  %v1904_v42 = vadd.f32 -1.0, %v2228_v30 }
 0x245   : > { %2229 = vpow2.f32 %v972_v37  ;;  %v906_v41 = vadd.f32 %v2799_v10, %v905_v39  ;;  %1165 = vmatmul.bf16.gmra.mxu3 %v1094_v38 }
 0x246   : > { %v1014_v31 = vmul.f32 1.6732632, %v1904_v42 }
 0x247   : > { %v936_v35 = vadd.f32 %v906_v41, %v2784_v62 }
 0x248   : > { %v1046_v51 = vsel %vm1030_vm4, %v934_v18, %v1014_v31 }
 0x249   : > { %v952_v24 = vmin.f32 %v936_v35, 0.0  ;;  %v2845_v13 = vmul.f32 1.050701, %v1046_v51  ;;  %vm1032_vm6 = vcmp.gt.f32.partialorder %v936_v35, 0.0 }
 0x24b   : > { %v2230_v43 = vpop.eup %2229  ;;  %v974_v46 = vmul.f32 1.442695, %v952_v24 }
 0x24c   : > { %v907_v47 = vpop.f32.mrf.mxu2  ;;  %v1905_v48 = vadd.f32 -1.0, %v2230_v43 }
 0x24d   : > { %2231 = vpow2.f32 %v974_v46  ;;  %v908_v44 = vadd.f32 %v2799_v10, %v907_v47 }
 0x24e   : > { %v1015_v50 = vmul.f32 1.6732632, %v1905_v48 }
 0x24f   : > { %v937_v53 = vadd.f32 %v908_v44, %v2786_v63 }
 0x250   : > { %v1047_v55 = vsel %vm1031_vm5, %v935_v34, %v1015_v50 }
 0x251   : > { %v953_v57 = vmin.f32 %v937_v53, 0.0  ;;  %v2847_v62 = vmul.f32 1.050701, %v1047_v55  ;;  %vm1033_vm7 = vcmp.gt.f32.partialorder %v937_v53, 0.0 }
 0x253   : > { %v2232_v40 = vpop.eup %2231  ;;  %v976_v59 = vmul.f32 1.442695, %v953_v57  ;;  %v1095_v60 = vpack.c.bf16 %v2847_v62, %v2845_v13 }
 0x254   : > { %v910_v61 = vpop.f32.mrf.mxu2  ;;  %v1906_v0 = vadd.f32 -1.0, %v2232_v40 }
 0x255   : > { %2233 = vpow2.f32 %v976_v59  ;;  %v911_v17 = vadd.f32 %v2799_v10, %v910_v61  ;;  %1170 = vmatmul.bf16.gmra.mxu3 %v1095_v60 }
 0x256   : > { %v1016_v3 = vmul.f32 1.6732632, %v1906_v0 }
 0x257   : > { %v938_v63 = vadd.f32 %v911_v17, %v2732_v27 }
 0x258   : > { %v1048_v14 = vsel %vm1032_vm6, %v936_v35, %v1016_v3 }
 0x259   : > { %v954_v1 = vmin.f32 %v938_v63, 0.0  ;;  %v2855_v19 = vmul.f32 1.050701, %v1048_v14  ;;  %vm1034_vm8 = vcmp.gt.f32.partialorder %v938_v63, 0.0 }
 0x25b   : > { %v2234_v4 = vpop.eup %2233  ;;  %v978_v54 = vmul.f32 1.442695, %v954_v1 }
 0x25c   : > { %v912_v5 = vpop.f32.mrf.mxu2  ;;  %v1907_v9 = vadd.f32 -1.0, %v2234_v4 }
 0x25d   : > { %2235 = vpow2.f32 %v978_v54  ;;  %v913_v11 = vadd.f32 %v2799_v10, %v912_v5 }
 0x25e   : > { %v1017_v12 = vmul.f32 1.6732632, %v1907_v9 }
 0x25f   : > { %v939_v15 = vadd.f32 %v913_v11, %v2737_v32 }
 0x260   : > { %v1049_v18 = vsel %vm1033_vm7, %v937_v53, %v1017_v12 }
 0x261   : > { %v955_v56 = vmin.f32 %v939_v15, 0.0  ;;  %v2857_v27 = vmul.f32 1.050701, %v1049_v18  ;;  %vm1035_vm9 = vcmp.gt.f32.partialorder %v939_v15, 0.0 }
 0x263   : > { %v2236_v16 = vpop.eup %2235  ;;  %v980_v20 = vmul.f32 1.442695, %v955_v56  ;;  %v1096_v23 = vpack.c.bf16 %v2857_v27, %v2855_v19 }
 0x264   : > { %v915_v25 = vpop.f32.mrf.mxu2  ;;  %v1908_v28 = vadd.f32 -1.0, %v2236_v16 }
 0x265   : > { %2237 = vpow2.f32 %v980_v20  ;;  %v916_v26 = vadd.f32 %v2799_v10, %v915_v25  ;;  %1175 = vmatmul.bf16.gmra.mxu3 %v1096_v23 }
 0x266   : > { %v1018_v34 = vmul.f32 1.6732632, %v1908_v28 }
 0x267   : > { %v940_v32 = vadd.f32 %v916_v26, %v2758_v2 }
 0x268   : > { %v1050_v41 = vsel %vm1034_vm8, %v938_v63, %v1018_v34 }
 0x269   : > { %v956_v33 = vmin.f32 %v940_v32, 0.0  ;;  %v2865_v31 = vmul.f32 1.050701, %v1050_v41  ;;  %vm1036_vm10 = vcmp.gt.f32.partialorder %v940_v32, 0.0 }
 0x26b   : > { %v2238_v36 = vpop.eup %2237  ;;  %v982_v21 = vmul.f32 1.442695, %v956_v33 }
 0x26c   : > { %v917_v30 = vpop.f32.mrf.mxu2  ;;  %v1909_v37 = vadd.f32 -1.0, %v2238_v36 }
 0x26d   : > { %2239 = vpow2.f32 %v982_v21  ;;  %v918_v38 = vadd.f32 %v2799_v10, %v917_v30 }
 0x26e   : > { %v1019_v39 = vmul.f32 1.6732632, %v1909_v37 }
 0x26f   : > { %v941_v42 = vadd.f32 %v918_v38, %v2761_v7 }
 0x270   : > { %v1051_v35 = vsel %vm1035_vm9, %v939_v15, %v1019_v39 }
 0x271   : > { %v957_v24 = vmin.f32 %v941_v42, 0.0  ;;  %v2867_v2 = vmul.f32 1.050701, %v1051_v35  ;;  %vm1037_vm11 = vcmp.gt.f32.partialorder %v941_v42, 0.0 }
 0x273   : > { %v2240_v43 = vpop.eup %2239  ;;  %v984_v46 = vmul.f32 1.442695, %v957_v24  ;;  %v1097_v47 = vpack.c.bf16 %v2867_v2, %v2865_v31 }
 0x274   : > { %v920_v48 = vpop.f32.mrf.mxu2  ;;  %v1910_v50 = vadd.f32 -1.0, %v2240_v43 }
 0x275   : > { %2241 = vpow2.f32 %v984_v46  ;;  %v921_v44 = vadd.f32 %v2799_v10, %v920_v48  ;;  %1180 = vmatmul.bf16.gmra.mxu3 %v1097_v47  ;;  %v2900_v46 = vld [vmem:[%s3011_s4 + $0x1] ss:$0 sm:$0xff] }
 0x276   : > { %v1020_v53 = vmul.f32 1.6732632, %v1910_v50 }
 0x277   : > { %v942_v7 = vadd.f32 %v921_v44, %v2778_v45 }
 0x278   : > { %v1052_v17 = vsel %vm1036_vm10, %v940_v32, %v1020_v53 }
 0x279   : > { %v958_v51 = vmin.f32 %v942_v7, 0.0  ;;  %v2875_v3 = vmul.f32 1.050701, %v1052_v17  ;;  %vm1038_vm12 = vcmp.gt.f32.partialorder %v942_v7, 0.0 }
 0x27b   : > { %v2242_v55 = vpop.eup %2241  ;;  %v986_v57 = vmul.f32 1.442695, %v958_v51 }
 0x27c   : > { %v922_v40 = vpop.f32.mrf.mxu2  ;;  %v1911_v59 = vadd.f32 -1.0, %v2242_v55 }
 0x27d   : > { %2243 = vpow2.f32 %v986_v57  ;;  %v923_v60 = vadd.f32 %v2799_v10, %v922_v40 }
 0x27e   : > { %v1021_v61 = vmul.f32 1.6732632, %v1911_v59 }
 0x27f   : > { %v943_v0 = vadd.f32 %v923_v60, %v2780_v49 }
 0x280   : > { %v1053_v63 = vsel %vm1037_vm11, %v941_v42, %v1021_v61 }
 0x281   : > { %v959_v1 = vmin.f32 %v943_v0, 0.0  ;;  %v2877_v45 = vmul.f32 1.050701, %v1053_v63  ;;  %vm1039_vm13 = vcmp.gt.f32.partialorder %v943_v0, 0.0 }
 0x283   : > { %v2244_v4 = vpop.eup %2243  ;;  %v988_v54 = vmul.f32 1.442695, %v959_v1  ;;  %v1098_v5 = vpack.c.bf16 %v2877_v45, %v2875_v3 }
 0x284   : > { %v925_v9 = vpop.f32.mrf.mxu2  ;;  %v1912_v12 = vadd.f32 -1.0, %v2244_v4 }
 0x285   : > { %2245 = vpow2.f32 %v988_v54  ;;  %v926_v11 = vadd.f32 %v2799_v10, %v925_v9  ;;  %1185 = vmatmul.bf16.gmra.mxu3 %v1098_v5 }
 0x286   : > { %v1022_v15 = vmul.f32 1.6732632, %v1912_v12 }
 0x287   : > { %v944_v49 = vadd.f32 %v926_v11, %v2790_v6 }
 0x288   : > { %v1054_v26 = vsel %vm1038_vm12, %v942_v7, %v1022_v15 }
 0x289   : > { %v960_v14 = vmin.f32 %v944_v49, 0.0  ;;  %v2885_v34 = vmul.f32 1.050701, %v1054_v26  ;;  %vm1040_vm14 = vcmp.gt.f32.partialorder %v944_v49, 0.0 }
 0x28b   : > { %v2246_v18 = vpop.eup %2245  ;;  %v990_v56 = vmul.f32 1.442695, %v960_v14 }
 0x28c   : > { %v927_v16 = vpop.f32.mrf.mxu2  ;;  %v1913_v20 = vadd.f32 -1.0, %v2246_v18 }
 0x28d   : > { %2247 = vpow2.f32 %v990_v56  ;;  %v928_v23 = vadd.f32 %v2799_v10, %v927_v16 }
 0x28e   : > { %v1023_v25 = vmul.f32 1.6732632, %v1913_v20 }
 0x28f   : > { %v945_v28 = vadd.f32 %v928_v23, %v2792_v8 }
 0x290   : > { %v1055_v32 = vsel %vm1039_vm13, %v943_v0, %v1023_v25 }
 0x291   : > { %v961_v33 = vmin.f32 %v945_v28, 0.0  ;;  %v2887_v6 = vmul.f32 1.050701, %v1055_v32  ;;  %vm1041_vm15 = vcmp.gt.f32.partialorder %v945_v28, 0.0 }
 0x293   : > { %v2248_v36 = vpop.eup %2247  ;;  %v992_v21 = vmul.f32 1.442695, %v961_v33  ;;  %v1099_v30 = vpack.c.bf16 %v2887_v6, %v2885_v34 }
 0x294   : > { %v1914_v10 = vadd.f32 -1.0, %v2248_v36 }
 0x295   : > { %2249 = vpow2.f32 %v992_v21  ;;  %1190 = vmatmul.bf16.gmra.mxu3 %v1099_v30 }
 0x296   : > { %v1024_v37 = vmul.f32 1.6732632, %v1914_v10 }
 0x298   : > { %v1056_v41 = vsel %vm1040_vm14, %v944_v49, %v1024_v37 }
 0x299   : > { %v2891_v35 = vmul.f32 1.050701, %v1056_v41 }
 0x29b   : > { %v2250_v38 = vpop.eup %2249 }
 0x29c   : > { %v1915_v39 = vadd.f32 -1.0, %v2250_v38 }
 0x29e   : > { %v1025_v8 = vmul.f32 1.6732632, %v1915_v39 }
 0x2a0   : > { %v1057_v42 = vsel %vm1041_vm15, %v945_v28, %v1025_v8 }
 0x2a1   : > { %v2893_v24 = vmul.f32 1.050701, %v1057_v42 }
 0x2a3   : > { %v1100_v43 = vpack.c.bf16 %v2893_v24, %v2891_v35 }
 0x2a5   : > { %1195 = vmatmul.bf16.gmra.mxu3 %v1100_v43 }
 0x2b8   : > { %v1161_v47 = vpop.f32.mrf.mxu3 }
 0x2b9   : > { %v1162_v48 = vadd.f32 %v2900_v46, %v1161_v47 }
 0x2bb   : > { %v1201_v44 = vmin.f32 %v1162_v48, 0.0  ;;  %vm1281_vm0 = vcmp.gt.f32.partialorder %v1162_v48, 0.0 }
 0x2bd   : > { %v1217_v50 = vmul.f32 1.442695, %v1201_v44 }
 0x2bf   : > { %2251 = vpow2.f32 %v1217_v50 }
 0x2c0   : > { %v1163_v7 = vpop.f32.mrf.mxu3 }
 0x2c1   : > { %v1164_v51 = vadd.f32 %v2900_v46, %v1163_v7 }
 0x2c3   : > { %v1202_v53 = vmin.f32 %v1164_v51, 0.0  ;;  %vm1282_vm1 = vcmp.gt.f32.partialorder %v1164_v51, 0.0 }
 0x2c5   : > { %v2252_v55 = vpop.eup %2251  ;;  %v1219_v57 = vmul.f32 1.442695, %v1202_v53 }
 0x2c6   : > { %v1949_v40 = vadd.f32 -1.0, %v2252_v55 }
 0x2c7   : > { %2253 = vpow2.f32 %v1219_v57 }
 0x2c8   : > { %v1166_v59 = vpop.f32.mrf.mxu3  ;;  %v1265_v17 = vmul.f32 1.6732632, %v1949_v40 }
 0x2c9   : > { %v1167_v60 = vadd.f32 %v2900_v46, %v1166_v59 }
 0x2ca   : > { %v1297_v4 = vsel %vm1281_vm0, %v1162_v48, %v1265_v17 }
 0x2cb   : > { %v1203_v61 = vmin.f32 %v1167_v60, 0.0  ;;  %v1313_v12 = vmul.f32 1.050701, %v1297_v4  ;;  %vm1283_vm2 = vcmp.gt.f32.partialorder %v1167_v60, 0.0 }
 0x2cd   : > { %v2254_v0 = vpop.eup %2253  ;;  %v1221_v63 = vmul.f32 1.442695, %v1203_v61 }
 0x2ce   : > { %v1950_v1 = vadd.f32 -1.0, %v2254_v0 }
 0x2cf   : > { %2255 = vpow2.f32 %v1221_v63 }
 0x2d0   : > { %v1266_v54 = vmul.f32 1.6732632, %v1950_v1  ;;  %v1168_v5 = vpop.f32.mrf.mxu3 }
 0x2d1   : > { %v1169_v9 = vadd.f32 %v2900_v46, %v1168_v5 }
 0x2d2   : > { %v1298_v11 = vsel %vm1282_vm1, %v1164_v51, %v1266_v54 }
 0x2d3   : > { %v1314_v49 = vmul.f32 1.050701, %v1298_v11  ;;  %v1204_v14 = vmin.f32 %v1169_v9, 0.0  ;;  %vm1284_vm3 = vcmp.gt.f32.partialorder %v1169_v9, 0.0 }
 0x2d5   : > { %v2256_v15 = vpop.eup %2255  ;;  %v1223_v18 = vmul.f32 1.442695, %v1204_v14  ;;  %v1329_v56 = vpack.c.bf16 %v1314_v49, %v1313_v12 }
 0x2d6   : > { %v1951_v16 = vadd.f32 -1.0, %v2256_v15 }
 0x2d7   : > { %2257 = vpow2.f32 %v1223_v18  ;;  %1345 = vmatmul.bf16.vlgmr.msrb.gmra.mxu0 %v1329_v56 }
 0x2d8   : > { %v1171_v20 = vpop.f32.mrf.mxu3  ;;  %v1267_v26 = vmul.f32 1.6732632, %v1951_v16 }
 0x2d9   : > { %v1172_v23 = vadd.f32 %v2900_v46, %v1171_v20 }
 0x2da   : > { %v1299_v30 = vsel %vm1283_vm2, %v1167_v60, %v1267_v26 }
 0x2db   : > { %v1205_v25 = vmin.f32 %v1172_v23, 0.0  ;;  %v1315_v39 = vmul.f32 1.050701, %v1299_v30  ;;  %vm1285_vm4 = vcmp.gt.f32.partialorder %v1172_v23, 0.0 }
 0x2dd   : > { %v2258_v28 = vpop.eup %2257  ;;  %v1225_v32 = vmul.f32 1.442695, %v1205_v25 }
 0x2de   : > { %v1952_v33 = vadd.f32 -1.0, %v2258_v28 }
 0x2df   : > { %2259 = vpow2.f32 %v1225_v32 }
 0x2e0   : > { %v1173_v36 = vpop.f32.mrf.mxu3  ;;  %v1268_v21 = vmul.f32 1.6732632, %v1952_v33 }
 0x2e1   : > { %v1174_v10 = vadd.f32 %v2900_v46, %v1173_v36 }
 0x2e2   : > { %v1300_v37 = vsel %vm1284_vm3, %v1169_v9, %v1268_v21 }
 0x2e3   : > { %v1206_v38 = vmin.f32 %v1174_v10, 0.0  ;;  %v1316_v8 = vmul.f32 1.050701, %v1300_v37  ;;  %vm1286_vm5 = vcmp.gt.f32.partialorder %v1174_v10, 0.0 }
 0x2e5   : > { %v2260_v41 = vpop.eup %2259  ;;  %v1227_v42 = vmul.f32 1.442695, %v1206_v38  ;;  %v1330_v43 = vpack.c.bf16 %v1316_v8, %v1315_v39 }
 0x2e6   : > { %v1953_v47 = vadd.f32 -1.0, %v2260_v41 }
 0x2e7   : > { %2261 = vpow2.f32 %v1227_v42  ;;  %1350 = vmatmul.bf16.gmra.mxu0 %v1330_v43 }
 0x2e8   : > { %v1176_v48 = vpop.f32.mrf.mxu3  ;;  %v1269_v7 = vmul.f32 1.6732632, %v1953_v47 }
 0x2e9   : > { %v1177_v44 = vadd.f32 %v2900_v46, %v1176_v48 }
 0x2ea   : > { %v1301_v59 = vsel %vm1285_vm4, %v1172_v23, %v1269_v7 }
 0x2eb   : > { %v1207_v50 = vmin.f32 %v1177_v44, 0.0  ;;  %v1317_v0 = vmul.f32 1.050701, %v1301_v59  ;;  %vm1287_vm6 = vcmp.gt.f32.partialorder %v1177_v44, 0.0 }
 0x2ed   : > { %v2262_v51 = vpop.eup %2261  ;;  %v1229_v53 = vmul.f32 1.442695, %v1207_v50 }
 0x2ee   : > { %v1954_v55 = vadd.f32 -1.0, %v2262_v51 }
 0x2ef   : > { %2263 = vpow2.f32 %v1229_v53 }
 0x2f0   : > { %v1178_v57 = vpop.f32.mrf.mxu3  ;;  %v1270_v40 = vmul.f32 1.6732632, %v1954_v55 }
 0x2f1   : > { %v1179_v60 = vadd.f32 %v2900_v46, %v1178_v57 }
 0x2f2   : > { %v1302_v61 = vsel %vm1286_vm5, %v1174_v10, %v1270_v40 }
 0x2f3   : > { %v1208_v17 = vmin.f32 %v1179_v60, 0.0  ;;  %v1318_v63 = vmul.f32 1.050701, %v1302_v61  ;;  %vm1288_vm7 = vcmp.gt.f32.partialorder %v1179_v60, 0.0 }
 0x2f5   : > { %v2264_v1 = vpop.eup %2263  ;;  %v1231_v4 = vmul.f32 1.442695, %v1208_v17  ;;  %v1331_v54 = vpack.c.bf16 %v1318_v63, %v1317_v0 }
 0x2f6   : > { %v1955_v5 = vadd.f32 -1.0, %v2264_v1 }
 0x2f7   : > { %2265 = vpow2.f32 %v1231_v4  ;;  %1355 = vmatmul.bf16.gmra.mxu0 %v1331_v54  ;;  %v2050_v54 = vld [vmem:[#allocation8 + $0x38] sm:$0xff] }
 0x2f8   : > { %v1181_v9 = vpop.f32.mrf.mxu3  ;;  %v1271_v49 = vmul.f32 1.6732632, %v1955_v5  ;;  %1606 = vmatpush.bf16.msrb.mxu1 %v2050_v54  ;;  %v2043_v54 = vld [vmem:[#allocation8] sm:$0xff] }
 0x2f9   : > { %v1182_v11 = vadd.f32 %v2900_v46, %v1181_v9 }
 0x2fa   : > { %v1303_v20 = vsel %vm1287_vm6, %v1177_v44, %v1271_v49 }
 0x2fb   : > { %v1209_v12 = vmin.f32 %v1182_v11, 0.0  ;;  %v1319_v28 = vmul.f32 1.050701, %v1303_v20  ;;  %vm1289_vm8 = vcmp.gt.f32.partialorder %v1182_v11, 0.0 }
 0x2fd   : > { %v2266_v14 = vpop.eup %2265  ;;  %v1233_v15 = vmul.f32 1.442695, %v1209_v12  ;;  %v2049_v12 = vld [vmem:[#allocation8 + $0x30] sm:$0xff] }
 0x2fe   : > { %v1956_v18 = vadd.f32 -1.0, %v2266_v14  ;;  %1607 = vmatpush.bf16.msrb.mxu1 %v2049_v12 }
 0x2ff   : > { %2267 = vpow2.f32 %v1233_v15 }
 0x300   : > { %v1183_v56 = vpop.f32.mrf.mxu3  ;;  %v1272_v16 = vmul.f32 1.6732632, %v1956_v18 }
 0x301   : > { %v1184_v23 = vadd.f32 %v2900_v46, %v1183_v56 }
 0x302   : > { %v1304_v25 = vsel %vm1288_vm7, %v1179_v60, %v1272_v16  ;;  %v2048_v16 = vld [vmem:[#allocation8 + $0x28] sm:$0xff] }
 0x303   : > { %v1210_v26 = vmin.f32 %v1184_v23, 0.0  ;;  %v1320_v32 = vmul.f32 1.050701, %v1304_v25  ;;  %vm1290_vm9 = vcmp.gt.f32.partialorder %v1184_v23, 0.0  ;;  %1608 = vmatpush.bf16.msrb.mxu1 %v2048_v16 }
 0x305   : > { %v2268_v33 = vpop.eup %2267  ;;  %v1235_v36 = vmul.f32 1.442695, %v1210_v26  ;;  %v1332_v21 = vpack.c.bf16 %v1320_v32, %v1319_v28  ;;  %v2047_v32 = vld [vmem:[#allocation8 + $0x20] sm:$0xff] }
 0x306   : > { %v1957_v30 = vadd.f32 -1.0, %v2268_v33 }
 0x307   : > { %2269 = vpow2.f32 %v1235_v36  ;;  %1360 = vmatmul.bf16.gmra.mxu0 %v1332_v21  ;;  %1609 = vmatpush.bf16.msrb.mxu1 %v2047_v32 }
 0x308   : > { %v1186_v10 = vpop.f32.mrf.mxu3  ;;  %v1273_v39 = vmul.f32 1.6732632, %v1957_v30 }
 0x309   : > { %v1187_v37 = vadd.f32 %v2900_v46, %v1186_v10 }
 0x30a   : > { %v1305_v48 = vsel %vm1289_vm8, %v1182_v11, %v1273_v39 }
 0x30b   : > { %v1211_v38 = vmin.f32 %v1187_v37, 0.0  ;;  %v1321_v51 = vmul.f32 1.050701, %v1305_v48  ;;  %vm1291_vm10 = vcmp.gt.f32.partialorder %v1187_v37, 0.0 }
 0x30d   : > { %v2270_v8 = vpop.eup %2269  ;;  %v1237_v41 = vmul.f32 1.442695, %v1211_v38 }
 0x30e   : > { %v1958_v42 = vadd.f32 -1.0, %v2270_v8 }
 0x30f   : > { %2271 = vpow2.f32 %v1237_v41 }
 0x310   : > { %v1188_v43 = vpop.f32.mrf.mxu3  ;;  %v1274_v47 = vmul.f32 1.6732632, %v1958_v42 }
 0x311   : > { %v1189_v44 = vadd.f32 %v2900_v46, %v1188_v43 }
 0x312   : > { %v1306_v50 = vsel %vm1290_vm9, %v1184_v23, %v1274_v47 }
 0x313   : > { %v1212_v7 = vmin.f32 %v1189_v44, 0.0  ;;  %v1322_v53 = vmul.f32 1.050701, %v1306_v50  ;;  %vm1292_vm11 = vcmp.gt.f32.partialorder %v1189_v44, 0.0 }
 0x315   : > { %v2272_v55 = vpop.eup %2271  ;;  %v1239_v57 = vmul.f32 1.442695, %v1212_v7  ;;  %v1333_v40 = vpack.c.bf16 %v1322_v53, %v1321_v51 }
 0x316   : > { %v1959_v59 = vadd.f32 -1.0, %v2272_v55 }
 0x317   : > { %2273 = vpow2.f32 %v1239_v57  ;;  %1365 = vmatmul.bf16.gmra.mxu0 %v1333_v40 }
 0x318   : > { %v1191_v60 = vpop.f32.mrf.mxu3  ;;  %v1275_v0 = vmul.f32 1.6732632, %v1959_v59 }
 0x319   : > { %v1192_v61 = vadd.f32 %v2900_v46, %v1191_v60 }
 0x31a   : > { %v1307_v11 = vsel %vm1291_vm10, %v1187_v37, %v1275_v0 }
 0x31b   : > { %v1213_v17 = vmin.f32 %v1192_v61, 0.0  ;;  %v1323_v18 = vmul.f32 1.050701, %v1307_v11  ;;  %vm1293_vm12 = vcmp.gt.f32.partialorder %v1192_v61, 0.0 }
 0x31d   : > { %v2274_v63 = vpop.eup %2273  ;;  %v1241_v1 = vmul.f32 1.442695, %v1213_v17 }
 0x31e   : > { %v1960_v4 = vadd.f32 -1.0, %v2274_v63  ;;  %v2046_v63 = vld [vmem:[#allocation8 + $0x18] sm:$0xff] }
 0x31f   : > { %2275 = vpow2.f32 %v1241_v1  ;;  %1610 = vmatpush.bf16.msrb.mxu1 %v2046_v63  ;;  %v2045_v1 = vld [vmem:[#allocation8 + $0x10] sm:$0xff] }
 0x320   : > { %v1193_v5 = vpop.f32.mrf.mxu3  ;;  %v1276_v9 = vmul.f32 1.6732632, %v1960_v4  ;;  %v2044_v4 = vld [vmem:[#allocation8 + $0x8] sm:$0xff] }
 0x321   : > { %v1194_v49 = vadd.f32 %v2900_v46, %v1193_v5 }
 0x322   : > { %v1308_v14 = vsel %vm1292_vm11, %v1189_v44, %v1276_v9 }
 0x323   : > { %v1214_v15 = vmin.f32 %v1194_v49, 0.0  ;;  %v1324_v56 = vmul.f32 1.050701, %v1308_v14  ;;  %vm1294_vm13 = vcmp.gt.f32.partialorder %v1194_v49, 0.0  ;;  %1611 = vmatpush.bf16.msrb.mxu1 %v2045_v1 }
 0x325   : > { %v2276_v20 = vpop.eup %2275  ;;  %v1243_v23 = vmul.f32 1.442695, %v1214_v15  ;;  %v1334_v25 = vpack.c.bf16 %v1324_v56, %v1323_v18 }
 0x326   : > { %v1961_v26 = vadd.f32 -1.0, %v2276_v20 }
 0x327   : > { %2277 = vpow2.f32 %v1243_v23  ;;  %1370 = vmatmul.bf16.gmra.mxu0 %v1334_v25  ;;  %1612 = vmatpush.bf16.msrb.mxu1 %v2044_v4 }
 0x328   : > { %v1196_v28 = vpop.f32.mrf.mxu3  ;;  %v1277_v21 = vmul.f32 1.6732632, %v1961_v26 }
 0x329   : > { %v1197_v33 = vadd.f32 %v2900_v46, %v1196_v28 }
 0x32a   : > { %v1309_v8 = vsel %vm1293_vm12, %v1192_v61, %v1277_v21 }
 0x32b   : > { %v1215_v36 = vmin.f32 %v1197_v33, 0.0  ;;  %v1325_v47 = vmul.f32 1.050701, %v1309_v8  ;;  %vm1295_vm14 = vcmp.gt.f32.partialorder %v1197_v33, 0.0  ;;  %1613 = vmatpush.bf16.msrb.mxu1 %v2043_v54 }
 0x32d   : > { %v2278_v30 = vpop.eup %2277  ;;  %v1245_v10 = vmul.f32 1.442695, %v1215_v36 }
 0x32e   : > { %v1962_v37 = vadd.f32 -1.0, %v2278_v30 }
 0x32f   : > { %2279 = vpow2.f32 %v1245_v10 }
 0x330   : > { %v1198_v38 = vpop.f32.mrf.mxu3  ;;  %v1278_v39 = vmul.f32 1.6732632, %v1962_v37 }
 0x331   : > { %v1199_v41 = vadd.f32 %v2900_v46, %v1198_v38 }
 0x332   : > { %v1310_v42 = vsel %vm1294_vm13, %v1194_v49, %v1278_v39 }
 0x333   : > { %v1216_v43 = vmin.f32 %v1199_v41, 0.0  ;;  %v1326_v48 = vmul.f32 1.050701, %v1310_v42  ;;  %vm1296_vm15 = vcmp.gt.f32.partialorder %v1199_v41, 0.0 }
 0x335   : > { %v2280_v44 = vpop.eup %2279  ;;  %v1247_v50 = vmul.f32 1.442695, %v1216_v43  ;;  %v1335_v7 = vpack.c.bf16 %v1326_v48, %v1325_v47 }
 0x336   : > { %v1963_v51 = vadd.f32 -1.0, %v2280_v44 }
 0x337   : > { %2281 = vpow2.f32 %v1247_v50  ;;  %1375 = vmatmul.bf16.gmra.mxu0 %v1335_v7 }
 0x338   : > { %v1279_v53 = vmul.f32 1.6732632, %v1963_v51 }
 0x33a   : > { %v1311_v59 = vsel %vm1295_vm14, %v1197_v33, %v1279_v53 }
 0x33b   : > { %v1327_v61 = vmul.f32 1.050701, %v1311_v59 }
 0x33d   : > { %v2282_v55 = vpop.eup %2281 }
 0x33e   : > { %v1964_v57 = vadd.f32 -1.0, %v2282_v55 }
 0x340   : > { %v1280_v40 = vmul.f32 1.6732632, %v1964_v57 }
 0x342   : > { %v1312_v60 = vsel %vm1296_vm15, %v1199_v41, %v1280_v40 }
 0x343   : > { %v1328_v17 = vmul.f32 1.050701, %v1312_v60 }
 0x345   : > { %v1336_v0 = vpack.c.bf16 %v1328_v17, %v1327_v61 }
 0x347   : > { %1380 = vmatmul.bf16.gmra.mxu0 %v1336_v0 }
 0x354   : > { %v1346_v5 = vpop.f32.mrf.mxu0 }
 0x355   : > { %v1347_v9 = vadd.f32 %v2900_v46, %v1346_v5 }
 0x357   : > { %v1386_v11 = vadd.f32 %v1347_v9, %v2825_v58 }
 0x359   : > { %v1402_v12 = vmin.f32 %v1386_v11, 0.0  ;;  %vm1482_vm0 = vcmp.gt.f32.partialorder %v1386_v11, 0.0 }
 0x35b   : > { %v1418_v49 = vmul.f32 1.442695, %v1402_v12 }
 0x35c   : > { %v1348_v14 = vpop.f32.mrf.mxu0 }
 0x35d   : > { %2283 = vpow2.f32 %v1418_v49  ;;  %v1349_v15 = vadd.f32 %v2900_v46, %v1348_v14 }
 0x35f   : > { %v1387_v18 = vadd.f32 %v1349_v15, %v2827_v52 }
 0x361   : > { %v1403_v56 = vmin.f32 %v1387_v18, 0.0  ;;  %vm1483_vm1 = vcmp.gt.f32.partialorder %v1387_v18, 0.0 }
 0x363   : > { %v2284_v16 = vpop.eup %2283  ;;  %v1420_v20 = vmul.f32 1.442695, %v1403_v56 }
 0x364   : > { %v1351_v23 = vpop.f32.mrf.mxu0  ;;  %v1965_v26 = vadd.f32 -1.0, %v2284_v16 }
 0x365   : > { %2285 = vpow2.f32 %v1420_v20  ;;  %v1352_v25 = vadd.f32 %v2900_v46, %v1351_v23 }
 0x366   : > { %v1466_v58 = vmul.f32 1.6732632, %v1965_v26 }
 0x367   : > { %v1388_v28 = vadd.f32 %v1352_v25, %v2835_v22 }
 0x368   : > { %v1498_v37 = vsel %vm1482_vm0, %v1386_v11, %v1466_v58 }
 0x369   : > { %v1404_v32 = vmin.f32 %v1388_v28, 0.0  ;;  %v1514_v41 = vmul.f32 1.050701, %v1498_v37  ;;  %vm1484_vm2 = vcmp.gt.f32.partialorder %v1388_v28, 0.0 }
 0x36b   : > { %v2286_v33 = vpop.eup %2285  ;;  %v1422_v36 = vmul.f32 1.442695, %v1404_v32 }
 0x36c   : > { %v1966_v21 = vadd.f32 -1.0, %v2286_v33  ;;  %v1353_v30 = vpop.f32.mrf.mxu0 }
 0x36d   : > { %2287 = vpow2.f32 %v1422_v36  ;;  %v1354_v52 = vadd.f32 %v2900_v46, %v1353_v30 }
 0x36e   : > { %v1467_v10 = vmul.f32 1.6732632, %v1966_v21 }
 0x36f   : > { %v1389_v38 = vadd.f32 %v1354_v52, %v2837_v29 }
 0x370   : > { %v1499_v39 = vsel %vm1483_vm1, %v1387_v18, %v1467_v10 }
 0x371   : > { %v1405_v8 = vmin.f32 %v1389_v38, 0.0  ;;  %v1515_v42 = vmul.f32 1.050701, %v1499_v39  ;;  %vm1485_vm3 = vcmp.gt.f32.partialorder %v1389_v38, 0.0 }
 0x373   : > { %v2288_v22 = vpop.eup %2287  ;;  %v1424_v43 = vmul.f32 1.442695, %v1405_v8  ;;  %v1530_v47 = vpack.c.bf16 %v1515_v42, %v1514_v41 }
 0x374   : > { %v1356_v48 = vpop.f32.mrf.mxu0  ;;  %v1967_v50 = vadd.f32 -1.0, %v2288_v22 }
 0x375   : > { %2289 = vpow2.f32 %v1424_v43  ;;  %v1357_v44 = vadd.f32 %v2900_v46, %v1356_v48  ;;  %1614 = vmatmul.bf16.vlgmr.msrb.gmra.mxu1 %v1530_v47 }
 0x376   : > { %v1468_v53 = vmul.f32 1.6732632, %v1967_v50 }
 0x377   : > { %v1390_v7 = vadd.f32 %v1357_v44, %v2845_v13 }
 0x378   : > { %v1500_v61 = vsel %vm1484_vm2, %v1388_v28, %v1468_v53 }
 0x379   : > { %v1406_v51 = vmin.f32 %v1390_v7, 0.0  ;;  %v1516_v1 = vmul.f32 1.050701, %v1500_v61  ;;  %vm1486_vm4 = vcmp.gt.f32.partialorder %v1390_v7, 0.0 }
 0x37b   : > { %v2290_v55 = vpop.eup %2289  ;;  %v1426_v57 = vmul.f32 1.442695, %v1406_v51 }
 0x37c   : > { %v1358_v29 = vpop.f32.mrf.mxu0  ;;  %v1968_v40 = vadd.f32 -1.0, %v2290_v55 }
 0x37d   : > { %2291 = vpow2.f32 %v1426_v57  ;;  %v1359_v59 = vadd.f32 %v2900_v46, %v1358_v29 }
 0x37e   : > { %v1469_v60 = vmul.f32 1.6732632, %v1968_v40 }
 0x37f   : > { %v1391_v17 = vadd.f32 %v1359_v59, %v2847_v62 }
 0x380   : > { %v1501_v0 = vsel %vm1485_vm3, %v1389_v38, %v1469_v60 }
 0x381   : > { %v1407_v63 = vmin.f32 %v1391_v17, 0.0  ;;  %v1517_v4 = vmul.f32 1.050701, %v1501_v0  ;;  %vm1487_vm5 = vcmp.gt.f32.partialorder %v1391_v17, 0.0 }
 0x383   : > { %v2292_v13 = vpop.eup %2291  ;;  %v1428_v54 = vmul.f32 1.442695, %v1407_v63  ;;  %v1531_v5 = vpack.c.bf16 %v1517_v4, %v1516_v1 }
 0x384   : > { %v1361_v9 = vpop.f32.mrf.mxu0  ;;  %v1969_v12 = vadd.f32 -1.0, %v2292_v13 }
 0x385   : > { %2293 = vpow2.f32 %v1428_v54  ;;  %v1362_v11 = vadd.f32 %v2900_v46, %v1361_v9  ;;  %1619 = vmatmul.bf16.gmra.mxu1 %v1531_v5 }
 0x386   : > { %v1470_v15 = vmul.f32 1.6732632, %v1969_v12 }
 0x387   : > { %v1392_v49 = vadd.f32 %v1362_v11, %v2855_v19 }
 0x388   : > { %v1502_v25 = vsel %vm1486_vm4, %v1390_v7, %v1470_v15 }
 0x389   : > { %v1408_v14 = vmin.f32 %v1392_v49, 0.0  ;;  %v1518_v58 = vmul.f32 1.050701, %v1502_v25  ;;  %vm1488_vm6 = vcmp.gt.f32.partialorder %v1392_v49, 0.0 }
 0x38b   : > { %v2294_v18 = vpop.eup %2293  ;;  %v1430_v62 = vmul.f32 1.442695, %v1408_v14 }
 0x38c   : > { %v1363_v56 = vpop.f32.mrf.mxu0  ;;  %v1970_v16 = vadd.f32 -1.0, %v2294_v18 }
 0x38d   : > { %2295 = vpow2.f32 %v1430_v62  ;;  %v1364_v20 = vadd.f32 %v2900_v46, %v1363_v56 }
 0x38e   : > { %v1471_v23 = vmul.f32 1.6732632, %v1970_v16 }
 0x38f   : > { %v1393_v26 = vadd.f32 %v1364_v20, %v2857_v27 }
 0x390   : > { %v1503_v28 = vsel %vm1487_vm5, %v1391_v17, %v1471_v23 }
 0x391   : > { %v1409_v32 = vmin.f32 %v1393_v26, 0.0  ;;  %v1519_v33 = vmul.f32 1.050701, %v1503_v28  ;;  %vm1489_vm7 = vcmp.gt.f32.partialorder %v1393_v26, 0.0 }
 0x393   : > { %v2296_v19 = vpop.eup %2295  ;;  %v1432_v36 = vmul.f32 1.442695, %v1409_v32  ;;  %v1532_v21 = vpack.c.bf16 %v1519_v33, %v1518_v58 }
 0x394   : > { %v1366_v30 = vpop.f32.mrf.mxu0  ;;  %v1971_v10 = vadd.f32 -1.0, %v2296_v19 }
 0x395   : > { %2297 = vpow2.f32 %v1432_v36  ;;  %v1367_v52 = vadd.f32 %v2900_v46, %v1366_v30  ;;  %1624 = vmatmul.bf16.gmra.mxu1 %v1532_v21 }
 0x396   : > { %v1472_v39 = vmul.f32 1.6732632, %v1971_v10 }
 0x397   : > { %v1394_v37 = vadd.f32 %v1367_v52, %v2865_v31 }
 0x398   : > { %v1504_v47 = vsel %vm1488_vm6, %v1392_v49, %v1472_v39 }
 0x399   : > { %v1410_v38 = vmin.f32 %v1394_v37, 0.0  ;;  %v1520_v7 = vmul.f32 1.050701, %v1504_v47  ;;  %vm1490_vm8 = vcmp.gt.f32.partialorder %v1394_v37, 0.0 }
 0x39b   : > { %v2298_v8 = vpop.eup %2297  ;;  %v1434_v27 = vmul.f32 1.442695, %v1410_v38 }
 0x39c   : > { %v1368_v41 = vpop.f32.mrf.mxu0  ;;  %v1972_v42 = vadd.f32 -1.0, %v2298_v8 }
 0x39d   : > { %2299 = vpow2.f32 %v1434_v27  ;;  %v1369_v22 = vadd.f32 %v2900_v46, %v1368_v41 }
 0x39e   : > { %v1473_v43 = vmul.f32 1.6732632, %v1972_v42 }
 0x39f   : > { %v1395_v48 = vadd.f32 %v1369_v22, %v2867_v2 }
 0x3a0   : > { %v1505_v44 = vsel %vm1489_vm7, %v1393_v26, %v1473_v43 }
 0x3a1   : > { %v1411_v50 = vmin.f32 %v1395_v48, 0.0  ;;  %v1521_v51 = vmul.f32 1.050701, %v1505_v44  ;;  %vm1491_vm9 = vcmp.gt.f32.partialorder %v1395_v48, 0.0 }
 0x3a3   : > { %v2300_v31 = vpop.eup %2299  ;;  %v1436_v53 = vmul.f32 1.442695, %v1411_v50  ;;  %v1533_v55 = vpack.c.bf16 %v1521_v51, %v1520_v7 }
 0x3a4   : > { %v1371_v57 = vpop.f32.mrf.mxu0  ;;  %v1973_v40 = vadd.f32 -1.0, %v2300_v31 }
 0x3a5   : > { %2301 = vpow2.f32 %v1436_v53  ;;  %v1372_v29 = vadd.f32 %v2900_v46, %v1371_v57  ;;  %1629 = vmatmul.bf16.gmra.mxu1 %v1533_v55 }
 0x3a6   : > { %v1474_v61 = vmul.f32 1.6732632, %v1973_v40 }
 0x3a7   : > { %v1396_v59 = vadd.f32 %v1372_v29, %v2875_v3 }
 0x3a8   : > { %v1506_v13 = vsel %vm1490_vm8, %v1394_v37, %v1474_v61 }
 0x3a9   : > { %v1412_v60 = vmin.f32 %v1396_v59, 0.0  ;;  %v1522_v11 = vmul.f32 1.050701, %v1506_v13  ;;  %vm1492_vm10 = vcmp.gt.f32.partialorder %v1396_v59, 0.0 }
 0x3ab   : > { %v2302_v17 = vpop.eup %2301  ;;  %v1438_v2 = vmul.f32 1.442695, %v1412_v60 }
 0x3ac   : > { %v1373_v0 = vpop.f32.mrf.mxu0  ;;  %v1974_v63 = vadd.f32 -1.0, %v2302_v17 }
 0x3ad   : > { %2303 = vpow2.f32 %v1438_v2  ;;  %v1374_v1 = vadd.f32 %v2900_v46, %v1373_v0 }
 0x3ae   : > { %v1475_v4 = vmul.f32 1.6732632, %v1974_v63  ;;  %v2154_v63 = vld [vmem:[%s3013_s6] ss:$0 sm:$0xff] }
 0x3af   : > { %v1397_v54 = vadd.f32 %v1374_v1, %v2877_v45 }
 0x3b0   : > { %v1507_v5 = vsel %vm1491_vm9, %v1395_v48, %v1475_v4 }
 0x3b1   : > { %v1413_v9 = vmin.f32 %v1397_v54, 0.0  ;;  %v1523_v12 = vmul.f32 1.050701, %v1507_v5  ;;  %vm1493_vm11 = vcmp.gt.f32.partialorder %v1397_v54, 0.0 }
 0x3b3   : > { %v2304_v3 = vpop.eup %2303  ;;  %v1440_v49 = vmul.f32 1.442695, %v1413_v9  ;;  %v1534_v14 = vpack.c.bf16 %v1523_v12, %v1522_v11 }
 0x3b4   : > { %v1376_v15 = vpop.f32.mrf.mxu0  ;;  %v1975_v62 = vadd.f32 -1.0, %v2304_v3 }
 0x3b5   : > { %2305 = vpow2.f32 %v1440_v49  ;;  %v1377_v18 = vadd.f32 %v2900_v46, %v1376_v15  ;;  %1634 = vmatmul.bf16.gmra.mxu1 %v1534_v14 }
 0x3b6   : > { %v1476_v20 = vmul.f32 1.6732632, %v1975_v62 }
 0x3b7   : > { %v1398_v56 = vadd.f32 %v1377_v18, %v2885_v34 }
 0x3b8   : > { %v1508_v58 = vsel %vm1492_vm10, %v1396_v59, %v1476_v20 }
 0x3b9   : > { %v1414_v16 = vmin.f32 %v1398_v56, 0.0  ;;  %v1524_v21 = vmul.f32 1.050701, %v1508_v58  ;;  %vm1494_vm12 = vcmp.gt.f32.partialorder %v1398_v56, 0.0 }
 0x3bb   : > { %v2306_v23 = vpop.eup %2305  ;;  %v1442_v45 = vmul.f32 1.442695, %v1414_v16 }
 0x3bc   : > { %v1378_v25 = vpop.f32.mrf.mxu0  ;;  %v1976_v26 = vadd.f32 -1.0, %v2306_v23 }
 0x3bd   : > { %2307 = vpow2.f32 %v1442_v45  ;;  %v1379_v28 = vadd.f32 %v2900_v46, %v1378_v25 }
 0x3be   : > { %v1477_v32 = vmul.f32 1.6732632, %v1976_v26 }
 0x3bf   : > { %v1399_v33 = vadd.f32 %v1379_v28, %v2887_v6 }
 0x3c0   : > { %v1509_v19 = vsel %vm1493_vm11, %v1397_v54, %v1477_v32 }
 0x3c1   : > { %v1415_v36 = vmin.f32 %v1399_v33, 0.0  ;;  %v1525_v30 = vmul.f32 1.050701, %v1509_v19  ;;  %vm1495_vm13 = vcmp.gt.f32.partialorder %v1399_v33, 0.0 }
 0x3c3   : > { %v2308_v34 = vpop.eup %2307  ;;  %v1444_v52 = vmul.f32 1.442695, %v1415_v36  ;;  %v1535_v10 = vpack.c.bf16 %v1525_v30, %v1524_v21 }
 0x3c4   : > { %v1381_v37 = vpop.f32.mrf.mxu0  ;;  %v1977_v39 = vadd.f32 -1.0, %v2308_v34 }
 0x3c5   : > { %2309 = vpow2.f32 %v1444_v52  ;;  %v1382_v38 = vadd.f32 %v2900_v46, %v1381_v37  ;;  %1639 = vmatmul.bf16.gmra.mxu1 %v1535_v10 }
 0x3c6   : > { %v1478_v41 = vmul.f32 1.6732632, %v1977_v39 }
 0x3c7   : > { %v1400_v8 = vadd.f32 %v1382_v38, %v2891_v35 }
 0x3c8   : > { %v1510_v44 = vsel %vm1494_vm12, %v1398_v56, %v1478_v41 }
 0x3c9   : > { %v1416_v27 = vmin.f32 %v1400_v8, 0.0  ;;  %v1526_v31 = vmul.f32 1.050701, %v1510_v44  ;;  %vm1496_vm14 = vcmp.gt.f32.partialorder %v1400_v8, 0.0 }
 0x3cb   : > { %v2310_v42 = vpop.eup %2309  ;;  %v1446_v6 = vmul.f32 1.442695, %v1416_v27 }
 0x3cc   : > { %v1383_v22 = vpop.f32.mrf.mxu0  ;;  %v1978_v43 = vadd.f32 -1.0, %v2310_v42 }
 0x3cd   : > { %2311 = vpow2.f32 %v1446_v6  ;;  %v1384_v47 = vadd.f32 %v2900_v46, %v1383_v22 }
 0x3ce   : > { %v1479_v48 = vmul.f32 1.6732632, %v1978_v43 }
 0x3cf   : > { %v1401_v50 = vadd.f32 %v1384_v47, %v2893_v24 }
 0x3d0   : > { %v1511_v7 = vsel %vm1495_vm13, %v1399_v33, %v1479_v48 }
 0x3d1   : > { %v1417_v51 = vmin.f32 %v1401_v50, 0.0  ;;  %v1527_v53 = vmul.f32 1.050701, %v1511_v7  ;;  %vm1497_vm15 = vcmp.gt.f32.partialorder %v1401_v50, 0.0 }
 0x3d3   : > { %v2312_v35 = vpop.eup %2311  ;;  %v1448_v55 = vmul.f32 1.442695, %v1417_v51  ;;  %v1536_v57 = vpack.c.bf16 %v1527_v53, %v1526_v31 }
 0x3d4   : > { %v1979_v29 = vadd.f32 -1.0, %v2312_v35 }
 0x3d5   : > { %2313 = vpow2.f32 %v1448_v55  ;;  %1644 = vmatmul.bf16.gmra.mxu1 %v1536_v57 }
 0x3d6   : > { %v1480_v40 = vmul.f32 1.6732632, %v1979_v29 }
 0x3d8   : > { %v1512_v61 = vsel %vm1496_vm14, %v1400_v8, %v1480_v40 }
 0x3d9   : > { %v1528_v17 = vmul.f32 1.050701, %v1512_v61 }
 0x3db   : > { %v2314_v59 = vpop.eup %2313 }
 0x3dc   : > { %v1980_v46 = vadd.f32 -1.0, %v2314_v59 }
 0x3de   : > { %v1481_v60 = vmul.f32 1.6732632, %v1980_v46 }
 0x3e0   : > { %v1513_v24 = vsel %vm1497_vm15, %v1401_v50, %v1481_v60 }
 0x3e1   : > { %v1529_v2 = vmul.f32 1.050701, %v1513_v24 }
 0x3e3   : > { %v1537_v0 = vpack.c.bf16 %v1529_v2, %v1528_v17 }
 0x3e5   : > { %1649 = vmatmul.bf16.gmra.mxu1 %v1537_v0 }
 0x3f2   : > { %v1615_v1 = vpop.f32.mrf.mxu1 }
 0x3f3   : > { %v1616_v4 = vadd.f32 %v2154_v63, %v1615_v1 }
 0x3f5   : > { %1655 = vst [vmem:[%s2955_s20] sm:$0xff] %v1616_v4 }
 0x3fa   : > { %v1617_v13 = vpop.f32.mrf.mxu1 }
 0x3fb   : > { %v1618_v54 = vadd.f32 %v2154_v63, %v1617_v13 }
 0x3fd   : > { %1656 = vst [vmem:[%s2955_s20 + $0x8] sm:$0xff] %v1618_v54 }
 0x402   : > { %v1620_v5 = vpop.f32.mrf.mxu1 }
 0x403   : > { %v1621_v9 = vadd.f32 %v2154_v63, %v1620_v5 }
 0x405   : > { %1657 = vst [vmem:[%s2955_s20 + $0x10] sm:$0xff] %v1621_v9 }
 0x40a   : > { %v1622_v11 = vpop.f32.mrf.mxu1 }
 0x40b   : > { %v1623_v12 = vadd.f32 %v2154_v63, %v1622_v11 }
 0x40d   : > { %1658 = vst [vmem:[%s2955_s20 + $0x18] sm:$0xff] %v1623_v12 }
 0x412   : > { %v1625_v3 = vpop.f32.mrf.mxu1 }
 0x413   : > { %v1626_v49 = vadd.f32 %v2154_v63, %v1625_v3 }
 0x415   : > { %1659 = vst [vmem:[%s2955_s20 + $0x20] sm:$0xff] %v1626_v49 }
 0x41a   : > { %v1627_v14 = vpop.f32.mrf.mxu1 }
 0x41b   : > { %v1628_v15 = vadd.f32 %v2154_v63, %v1627_v14 }
 0x41d   : > { %1660 = vst [vmem:[%s2955_s20 + $0x28] sm:$0xff] %v1628_v15 }
 0x422   : > { %v1630_v18 = vpop.f32.mrf.mxu1 }
 0x423   : > { %v1631_v62 = vadd.f32 %v2154_v63, %v1630_v18 }
 0x425   : > { %1661 = vst [vmem:[%s2955_s20 + $0x30] sm:$0xff] %v1631_v62 }
 0x42a   : > { %v1632_v56 = vpop.f32.mrf.mxu1 }
 0x42b   : > { %v1633_v16 = vadd.f32 %v2154_v63, %v1632_v56 }
 0x42d   : > { %1662 = vst [vmem:[%s2955_s20 + $0x38] sm:$0xff] %v1633_v16 }
 0x432   : > { %v1635_v20 = vpop.f32.mrf.mxu1 }
 0x433   : > { %v1636_v23 = vadd.f32 %v2154_v63, %v1635_v20 }
 0x435   : > { %1663 = vst [vmem:[%s2955_s20 + $0x40] sm:$0xff] %v1636_v23 }
 0x43a   : > { %v1637_v45 = vpop.f32.mrf.mxu1 }
 0x43b   : > { %v1638_v25 = vadd.f32 %v2154_v63, %v1637_v45 }
 0x43d   : > { %1664 = vst [vmem:[%s2955_s20 + $0x48] sm:$0xff] %v1638_v25 }
 0x442   : > { %v1640_v26 = vpop.f32.mrf.mxu1 }
 0x443   : > { %v1641_v28 = vadd.f32 %v2154_v63, %v1640_v26 }
 0x445   : > { %1665 = vst [vmem:[%s2955_s20 + $0x50] sm:$0xff] %v1641_v28 }
 0x44a   : > { %v1642_v32 = vpop.f32.mrf.mxu1 }
 0x44b   : > { %v1643_v58 = vadd.f32 %v2154_v63, %v1642_v32 }
 0x44d   : > { %1666 = vst [vmem:[%s2955_s20 + $0x58] sm:$0xff] %v1643_v58 }
 0x452   : > { %v1645_v33 = vpop.f32.mrf.mxu1 }
 0x453   : > { %v1646_v19 = vadd.f32 %v2154_v63, %v1645_v33 }
 0x455   : > { %1667 = vst [vmem:[%s2955_s20 + $0x60] sm:$0xff] %v1646_v19 }
 0x45a   : > { %v1647_v36 = vpop.f32.mrf.mxu1 }
 0x45b   : > { %v1648_v21 = vadd.f32 %v2154_v63, %v1647_v36 }
 0x45d   : > { %1668 = vst [vmem:[%s2955_s20 + $0x68] sm:$0xff] %v1648_v21 }
 0x462   : > { %v1650_v30 = vpop.f32.mrf.mxu1 }
 0x463   : > { %v1651_v34 = vadd.f32 %v2154_v63, %v1650_v30 }
 0x465   : > { %1669 = vst [vmem:[%s2955_s20 + $0x70] sm:$0xff] %v1651_v34 }
 0x46a   : > { %v1652_v52 = vpop.f32.mrf.mxu1 }
 0x46b   : > { %v1653_v10 = vadd.f32 %v2154_v63, %v1652_v52 }
 0x46d   : > { %1670 = vst [vmem:[%s2955_s20 + $0x78] sm:$0xff] %v1653_v10 }
 0x46e   : > { %2462 = shalt.err (!%p2459_p10)
}
 0x46f   : > { %s2518_s22 = smov 128   ;;  %s2519_s20 = smov 8  }
 0x470   : > { %2082 = dma.vmem_to_hbm [thread:$0]  (%p2643_p7), %s1685_s15, 2048, %s1687_s30, %s1672_s12, %s2518_s22, %s2518_s22, %s2519_s20  }
 0x471 PF: > { %s1701_s21 = sand.u32 1, %s2497_s24   ;;  %p3023_p12 = scmp.ge.s32.totalorder %s2509_s27, 2 }
 0x472   : > { %s1702_s9 = scalar_lea.sflag [#allocation4], %s1701_s21 }
 0x473   : > { %p2099_p13 = pnand %p3023_p12, %p2595_p6 }
 0x475   : > { %p2100_p0 = pneg %p2099_p13 }
 0x477   : > { %2492 = dma.done.wait (%p2100_p0), %s1702_s9, 2048  }
 0x478   : > { %2494 = vsyncadd (%p2100_p0), %s1702_s9, 4294965248  ;;  %p22_p3 = scmp.ge.s32.totalorder %s2627_s11, 4   ;;  %s3024_s24 = smov %s2501_s25 }
 0x479   : > { %s3025_s25 = smov %s2505_s26  ;;  %s3026_s26 = smov %s2639_s17 }
 0x47a   : > { %s3027_s27 = smov %s2627_s11  ;;  %24 = sbr.rel (!%p22_p3) target bundleno = 9 (0x9), region = 107 }
 0x47f   :  { %1708 = vsyncpa [#allocation3], 1 }
 0x480   :  { %1710 = vsyncpa [#allocation3 + $0x1], 1 }
 0x481   :  { %1711 = vsyncpa [#allocation6], 1 }
 0x482   :  { %1712 = vsyncpa [#allocation9], 1 }
 0x483   :  { %1713 = vsyncpa [#allocation4], 1 }
 0x484   :  { %1715 = vsyncpa [#allocation4 + $0x1], 1 }

</bundles_post_ra>
